<compile_context>
chip_gen: v7x
topology: tpu7x:2x2x1
jax: 0.10.0
libtpu: 0.0.40
codegen_flags: <defaults>
</compile_context>

<pallas_src>
import jax
import jax.numpy as jnp
from jax import lax
from jax.experimental import pallas as pl
from jax.experimental.pallas import tpu as pltpu


# ----------------------------------------------------------------------- helpers
def _round_up(x, m):
    return (x + m - 1) // m * m


def _act(v, kind):
    if kind == "lrelu":        # nn.LeakyReLU(0.2)
        return jnp.where(v > 0, v, 0.2 * v)
    if kind == "relu":         # nn.ReLU
        return jnp.maximum(v, 0.0)
    return v


# ------------------------------------- Conv2d(kernel=4, stride=2, pad=1, bias=False)
def _make_down_kernel(Mext, Wp2, pre_act):
    def kernel(x_ref, w_ref, o_ref):
        # x_ref: (1, 4, Sx, Cin)   stride-phase split, flattened, zero-padded input
        # w_ref: (4, 4, Cin, Cout) conv weight, tap-major
        # o_ref: (1, Mext, Cout)   extended output (Ho x (Wo+1) rows, last col junk)
        cout = o_ref.shape[-1]
        acc = jnp.zeros((Mext, cout), jnp.float32)
        for kh in range(4):
            a, p = divmod(kh, 2)
            for kw in range(4):
                b, q = divmod(kw, 2)
                tap = _act(x_ref[0, 2 * p + q, pl.ds(a * Wp2 + b, Mext), :], pre_act)
                acc = acc + jnp.dot(tap, w_ref[kh, kw],
                                    preferred_element_type=jnp.float32)
        o_ref[0] = acc
    return kernel


def down_conv(x, w, pre_act=None):
    """x: (N, H, W, Cin) NHWC (H, W even); w: (4, 4, Cin, Cout) -> (N, H//2, W//2, Cout)."""
    N, H, W, Cin = x.shape
    Cout = w.shape[-1]
    Ho, Wo = H // 2, W // 2
    Hp2, Wp2 = Ho + 1, Wo + 1
    # pad=1 then split the 2x2 stride phases (layout plumbing only).
    xp = jnp.pad(x, ((0, 0), (1, 1), (1, 1), (0, 0)))
    xps = xp.reshape(N, Hp2, 2, Wp2, 2, Cin).transpose(0, 2, 4, 1, 3, 5)
    xf = xps.reshape(N, 4, Hp2 * Wp2, Cin)
    Sx = _round_up(Hp2 * Wp2 + 1, 8)
    xf = jnp.pad(xf, ((0, 0), (0, 0), (0, Sx - Hp2 * Wp2), (0, 0)))
    Mext = Ho * Wp2

    yext = pl.pallas_call(
        _make_down_kernel(Mext, Wp2, pre_act),
        out_shape=jax.ShapeDtypeStruct((N, Mext, Cout), jnp.float32),
        grid=(N,),
        in_specs=[
            pl.BlockSpec((1, 4, Sx, Cin), lambda n: (n, 0, 0, 0)),
            pl.BlockSpec((4, 4, Cin, Cout), lambda n: (0, 0, 0, 0)),
        ],
        out_specs=pl.BlockSpec((1, Mext, Cout), lambda n: (n, 0, 0)),
        compiler_params=pltpu.CompilerParams(dimension_semantics=("parallel",)),
    )(xf, w)
    return yext.reshape(N, Ho, Wp2, Cout)[:, :, :Wo, :]


# -------------------------------- ConvTranspose2d(kernel=4, stride=2, pad=1)
# Output phase r -> ((kernel index k, padded-input shift s), ...); y[2m+r] uses xe[m+s]*W[k].
_UP_TAPS = (((1, 1), (3, 0)),   # r = 0
            ((0, 2), (2, 1)))   # r = 1


def _make_up_kernel(Mext, We, pre_act, with_bias, post_tanh):
    def kernel(*refs):
        if with_bias:
            x_ref, w_ref, b_ref, o_ref = refs
        else:
            x_ref, w_ref, o_ref = refs
            b_ref = None
        # x_ref: (1, Sx, Cin)  padded input, flattened; w_ref: (4, 4, Cin, Cout)
        # o_ref: (1, 4, Mext, Cout)  one extended (H x (W+2)) slab per output phase
        cout = o_ref.shape[-1]
        for rh in range(2):
            for rw in range(2):
                acc = jnp.zeros((Mext, cout), jnp.float32)
                for kh, sh in _UP_TAPS[rh]:
                    for kw, sw in _UP_TAPS[rw]:
                        tap = _act(x_ref[0, pl.ds(sh * We + sw, Mext), :], pre_act)
                        acc = acc + jnp.dot(tap, w_ref[kh, kw],
                                            preferred_element_type=jnp.float32)
                if with_bias:
                    acc = acc + b_ref[...]
                if post_tanh:
                    acc = jnp.tanh(acc)
                o_ref[0, 2 * rh + rw] = acc
    return kernel


def up_conv(x, w, pre_act="relu", bias=None, post_tanh=False):
    """x: (N, H, W, Cin); w: (4, 4, Cin, Cout) (= PyTorch weight[cin,cout,kh,kw] permuted).
    Returns (N, 2H, 2W, Cout)."""
    N, H, W, Cin = x.shape
    Cout = w.shape[-1]
    He, We = H + 2, W + 2
    xe = jnp.pad(x, ((0, 0), (1, 1), (1, 1), (0, 0)))
    xf = xe.reshape(N, He * We, Cin)
    Sx = _round_up(He * We + 2, 8)
    xf = jnp.pad(xf, ((0, 0), (0, Sx - He * We), (0, 0)))
    Mext = H * We

    in_specs = [
        pl.BlockSpec((1, Sx, Cin), lambda n: (n, 0, 0)),
        pl.BlockSpec((4, 4, Cin, Cout), lambda n: (0, 0, 0, 0)),
    ]
    args = [xf, w]
    if bias is not None:
        in_specs.append(pl.BlockSpec((1, Cout), lambda n: (0, 0)))
        args.append(bias.reshape(1, Cout))

    yext = pl.pallas_call(
        _make_up_kernel(Mext, We, pre_act, bias is not None, post_tanh),
        out_shape=jax.ShapeDtypeStruct((N, 4, Mext, Cout), jnp.float32),
        grid=(N,),
        in_specs=in_specs,
        out_specs=pl.BlockSpec((1, 4, Mext, Cout), lambda n: (n, 0, 0, 0)),
        compiler_params=pltpu.CompilerParams(dimension_semantics=("parallel",)),
    )(*args)
    y = yext.reshape(N, 2, 2, H, We, Cout)[:, :, :, :, :W, :]
    return y.transpose(0, 3, 1, 4, 2, 5).reshape(N, 2 * H, 2 * W, Cout)


# --------------------------------------------- BatchNorm2d (batch statistics)
def _bn_kernel(x_ref, g_ref, b_ref, o_ref):
    x = x_ref[...]                                   # (R, C)
    mean = jnp.mean(x, axis=0, keepdims=True)
    xc = x - mean
    var = jnp.mean(xc * xc, axis=0, keepdims=True)
    o_ref[...] = xc * lax.rsqrt(var + 1e-5) * g_ref[...] + b_ref[...]


def batch_norm(x, gamma, beta):
    N, H, W, C = x.shape
    out = pl.pallas_call(
        _bn_kernel,
        out_shape=jax.ShapeDtypeStruct((N * H * W, C), jnp.float32),
    )(x.reshape(N * H * W, C), gamma.reshape(1, C), beta.reshape(1, C))
    return out.reshape(N, H, W, C)


# ---------------------------------------------------------------- U-Net wiring
def _block_forward(x, p, ops):
    """Mirrors UnetSkipConnectionBlock.forward; `ops` = (down, up, bn) primitives."""
    down, up, bn = ops
    h = down(x, p["down_w"], None if p["outermost"] else "lrelu")
    if "down_gamma" in p:
        h = bn(h, p["down_gamma"], p["down_beta"])
    if p["sub"] is not None:
        h = _block_forward(h, p["sub"], ops)
    u = up(h, p["up_w"], "relu", p.get("up_bias"), p["outermost"])
    if p["outermost"]:
        return u
    u = bn(u, p["up_gamma"], p["up_beta"])
    return jnp.concatenate([x, u], axis=-1)          # torch.cat([x, model(x)], 1)


def unet_forward(x_nchw, params):
    x = jnp.transpose(x_nchw, (0, 2, 3, 1)).astype(jnp.float32)
    y = _block_forward(x, params, (down_conv, up_conv, batch_norm))
    return jnp.transpose(y, (0, 3, 1, 2))


# ------------------------------------------------ plain-JAX reference (checks only)
def _ref_down(x, w, pre_act=None):
    return lax.conv_general_dilated(
        _act(x, pre_act), w, (2, 2), ((1, 1), (1, 1)),
        dimension_numbers=("NHWC", "HWIO", "NHWC"),
        precision=lax.Precision.HIGHEST)


def _ref_up(x, w, pre_act="relu", bias=None, post_tanh=False):
    y = lax.conv_general_dilated(
        _act(x, pre_act), w[::-1, ::-1, :, :], (1, 1), ((2, 2), (2, 2)),
        lhs_dilation=(2, 2),
        dimension_numbers=("NHWC", "HWIO", "NHWC"),
        precision=lax.Precision.HIGHEST)
    if bias is not None:
        y = y + bias
    if post_tanh:
        y = jnp.tanh(y)
    return y


def _ref_bn(x, g, b):
    mean = jnp.mean(x, axis=(0, 1, 2), keepdims=True)
    var = jnp.mean((x - mean) ** 2, axis=(0, 1, 2), keepdims=True)
    return (x - mean) * lax.rsqrt(var + 1e-5) * g + b


# ----------------------------------------------------------------- parameters
def build_unet_params(key, input_nc, output_nc, num_downs, ngf):
    keys = iter(jax.random.split(key, 2 * num_downs + 1))

    def conv_w(cin, cout):
        return 0.05 * jax.random.normal(next(keys), (4, 4, cin, cout), jnp.float32)

    def make_block(outer_nc, inner_nc, in_nc, sub, innermost=False, outermost=False):
        p = {"sub": sub, "innermost": innermost, "outermost": outermost}
        p["down_w"] = conv_w(in_nc, inner_nc)
        if not innermost and not outermost:
            p["down_gamma"] = jnp.ones((inner_nc,), jnp.float32)
            p["down_beta"] = jnp.zeros((inner_nc,), jnp.float32)
        up_in = inner_nc if innermost else 2 * inner_nc
        p["up_w"] = conv_w(up_in, outer_nc)
        if outermost:
            p["up_bias"] = 0.05 * jax.random.normal(next(keys), (outer_nc,), jnp.float32)
        else:
            p["up_gamma"] = jnp.ones((outer_nc,), jnp.float32)
            p["up_beta"] = jnp.zeros((outer_nc,), jnp.float32)
        return p

    blk = make_block(ngf * 8, ngf * 8, ngf * 8, None, innermost=True)
    for _ in range(num_downs - 5):
        blk = make_block(ngf * 8, ngf * 8, ngf * 8, blk)
    blk = make_block(ngf * 4, ngf * 8, ngf * 4, blk)
    blk = make_block(ngf * 2, ngf * 4, ngf * 2, blk)
    blk = make_block(ngf, ngf * 2, ngf, blk)
    blk = make_block(output_nc, ngf, input_nc, blk, outermost=True)
    return blk


# ------------------------------------------------------------------------ main
if __name__ == "__main__":
    root = jax.random.PRNGKey(0)
    k_in, k_par, k_t = jax.random.split(root, 3)

    # Per-primitive correctness checks against the plain-JAX (XLA) reference,
    # at shapes taken from the network below.
    tk = iter(jax.random.split(k_t, 16))
    xa = jax.random.normal(next(tk), (2, 32, 32, 3), jnp.float32)
    wa = 0.05 * jax.random.normal(next(tk), (4, 4, 3, 8), jnp.float32)
    assert jnp.allclose(down_conv(xa, wa, None), _ref_down(xa, wa, None),
                        rtol=2e-2, atol=1e-3)
    xb = jax.random.normal(next(tk), (2, 8, 8, 16), jnp.float32)
    wb = 0.05 * jax.random.normal(next(tk), (4, 4, 16, 32), jnp.float32)
    assert jnp.allclose(down_conv(xb, wb, "lrelu"), _ref_down(xb, wb, "lrelu"),
                        rtol=2e-2, atol=1e-3)
    xc = jax.random.normal(next(tk), (2, 2, 2, 64), jnp.float32)
    wc = 0.05 * jax.random.normal(next(tk), (4, 4, 64, 32), jnp.float32)
    assert jnp.allclose(up_conv(xc, wc, "relu"), _ref_up(xc, wc, "relu"),
                        rtol=2e-2, atol=1e-3)
    xd = jax.random.normal(next(tk), (2, 16, 16, 16), jnp.float32)
    wd = 0.05 * jax.random.normal(next(tk), (4, 4, 16, 3), jnp.float32)
    bd = 0.05 * jax.random.normal(next(tk), (3,), jnp.float32)
    assert jnp.allclose(up_conv(xd, wd, "relu", bd, True),
                        _ref_up(xd, wd, "relu", bd, True), rtol=2e-2, atol=1e-3)
    xe = jax.random.normal(next(tk), (2, 8, 8, 16), jnp.float32)
    ge = jnp.ones((16,), jnp.float32)
    be = jnp.zeros((16,), jnp.float32)
    assert jnp.allclose(batch_norm(xe, ge, be), _ref_bn(xe, ge, be),
                        rtol=2e-2, atol=1e-3)

    # Small config consistent with the module: num_downs=5 requires spatial >= 2**5.
    N, input_nc, output_nc, num_downs, ngf, S = 2, 3, 3, 5, 8, 32
    x = jax.random.normal(k_in, (N, input_nc, S, S), jnp.float32)
    params = build_unet_params(k_par, input_nc, output_nc, num_downs, ngf)

    y = jax.block_until_ready(unet_forward(x, params))
    assert y.shape == (N, output_nc, S, S)
    assert bool(jnp.all(jnp.isfinite(y)))
    assert bool(jnp.all(jnp.abs(y) <= 1.0))          # final Tanh bound

    print("KERNEL_OK")
</pallas_src>

<mosaic_0001>
module attributes {stable_mosaic.version = 11 : i64} {
  func.func @kernel(%arg0: i32, %arg1: memref<1x4x296x3xf32, #tpu.memory_space<vmem>>, %arg2: memref<4x4x3x8xf32, #tpu.memory_space<vmem>>, %arg3: memref<1x272x8xf32, #tpu.memory_space<vmem>>) attributes {dimension_semantics = [#tpu.dimension_semantics<parallel>], iteration_bounds = array<i64: 2>, scalar_prefetch = 0 : i64, scratch_operands = 0 : i64, tpu.core_type = #tpu.core_type<tc>, window_params = [{transform_indices = @transform_0, window_bounds = array<i64: 1, 4, 296, 3>}, {pipeline_mode = #tpu.pipeline_mode<synchronous>, transform_indices = @transform_1, window_bounds = array<i64: 4, 4, 3, 8>}, {transform_indices = @transform_2, window_bounds = array<i64: 1, 272, 8>}]} {
    %cst = arith.constant 0.000000e+00 : f32
    %0 = vector.broadcast %cst : f32 to vector<272x8xf32>
    %c0 = arith.constant 0 : index
    %c0_0 = arith.constant 0 : index
    %c0_1 = arith.constant 0 : index
    %c0_2 = arith.constant 0 : index
    %1 = vector.load %arg1[%c0, %c0_0, %c0_1, %c0_2] : memref<1x4x296x3xf32, #tpu.memory_space<vmem>>, vector<1x1x272x3xf32>
    %2 = vector.shape_cast %1 : vector<1x1x272x3xf32> to vector<272x3xf32>
    %c0_3 = arith.constant 0 : index
    %c0_4 = arith.constant 0 : index
    %c0_5 = arith.constant 0 : index
    %c0_6 = arith.constant 0 : index
    %3 = vector.load %arg2[%c0_3, %c0_4, %c0_5, %c0_6] : memref<4x4x3x8xf32, #tpu.memory_space<vmem>>, vector<1x1x3x8xf32>
    %4 = vector.shape_cast %3 : vector<1x1x3x8xf32> to vector<3x8xf32>
    %cst_7 = arith.constant dense<0.000000e+00> : vector<272x8xf32>
    %5 = tpu.matmul %2, %4, %cst_7 {dimension_numbers = #tpu.dot_dimension_numbers<[1], [0], [0], [1], [0, 0, 1, 1], [], []>} : vector<272x3xf32>, vector<3x8xf32>, vector<272x8xf32> -> vector<272x8xf32>
    %6 = arith.addf %0, %5 : vector<272x8xf32>
    %c0_8 = arith.constant 0 : index
    %c1 = arith.constant 1 : index
    %c0_9 = arith.constant 0 : index
    %c0_10 = arith.constant 0 : index
    %7 = vector.load %arg1[%c0_8, %c1, %c0_9, %c0_10] : memref<1x4x296x3xf32, #tpu.memory_space<vmem>>, vector<1x1x272x3xf32>
    %8 = vector.shape_cast %7 : vector<1x1x272x3xf32> to vector<272x3xf32>
    %c0_11 = arith.constant 0 : index
    %c1_12 = arith.constant 1 : index
    %c0_13 = arith.constant 0 : index
    %c0_14 = arith.constant 0 : index
    %9 = vector.load %arg2[%c0_11, %c1_12, %c0_13, %c0_14] : memref<4x4x3x8xf32, #tpu.memory_space<vmem>>, vector<1x1x3x8xf32>
    %10 = vector.shape_cast %9 : vector<1x1x3x8xf32> to vector<3x8xf32>
    %cst_15 = arith.constant dense<0.000000e+00> : vector<272x8xf32>
    %11 = tpu.matmul %8, %10, %cst_15 {dimension_numbers = #tpu.dot_dimension_numbers<[1], [0], [0], [1], [0, 0, 1, 1], [], []>} : vector<272x3xf32>, vector<3x8xf32>, vector<272x8xf32> -> vector<272x8xf32>
    %12 = arith.addf %6, %11 : vector<272x8xf32>
    %c0_16 = arith.constant 0 : index
    %c0_17 = arith.constant 0 : index
    %c1_18 = arith.constant 1 : index
    %c0_19 = arith.constant 0 : index
    %13 = vector.load %arg1[%c0_16, %c0_17, %c1_18, %c0_19] : memref<1x4x296x3xf32, #tpu.memory_space<vmem>>, vector<1x1x272x3xf32>
    %14 = vector.shape_cast %13 : vector<1x1x272x3xf32> to vector<272x3xf32>
    %c0_20 = arith.constant 0 : index
    %c2 = arith.constant 2 : index
    %c0_21 = arith.constant 0 : index
    %c0_22 = arith.constant 0 : index
    %15 = vector.load %arg2[%c0_20, %c2, %c0_21, %c0_22] : memref<4x4x3x8xf32, #tpu.memory_space<vmem>>, vector<1x1x3x8xf32>
    %16 = vector.shape_cast %15 : vector<1x1x3x8xf32> to vector<3x8xf32>
    %cst_23 = arith.constant dense<0.000000e+00> : vector<272x8xf32>
    %17 = tpu.matmul %14, %16, %cst_23 {dimension_numbers = #tpu.dot_dimension_numbers<[1], [0], [0], [1], [0, 0, 1, 1], [], []>} : vector<272x3xf32>, vector<3x8xf32>, vector<272x8xf32> -> vector<272x8xf32>
    %18 = arith.addf %12, %17 : vector<272x8xf32>
    %c0_24 = arith.constant 0 : index
    %c1_25 = arith.constant 1 : index
    %c1_26 = arith.constant 1 : index
    %c0_27 = arith.constant 0 : index
    %19 = vector.load %arg1[%c0_24, %c1_25, %c1_26, %c0_27] : memref<1x4x296x3xf32, #tpu.memory_space<vmem>>, vector<1x1x272x3xf32>
    %20 = vector.shape_cast %19 : vector<1x1x272x3xf32> to vector<272x3xf32>
    %c0_28 = arith.constant 0 : index
    %c3 = arith.constant 3 : index
    %c0_29 = arith.constant 0 : index
    %c0_30 = arith.constant 0 : index
    %21 = vector.load %arg2[%c0_28, %c3, %c0_29, %c0_30] : memref<4x4x3x8xf32, #tpu.memory_space<vmem>>, vector<1x1x3x8xf32>
    %22 = vector.shape_cast %21 : vector<1x1x3x8xf32> to vector<3x8xf32>
    %cst_31 = arith.constant dense<0.000000e+00> : vector<272x8xf32>
    %23 = tpu.matmul %20, %22, %cst_31 {dimension_numbers = #tpu.dot_dimension_numbers<[1], [0], [0], [1], [0, 0, 1, 1], [], []>} : vector<272x3xf32>, vector<3x8xf32>, vector<272x8xf32> -> vector<272x8xf32>
    %24 = arith.addf %18, %23 : vector<272x8xf32>
    %c0_32 = arith.constant 0 : index
    %c2_33 = arith.constant 2 : index
    %c0_34 = arith.constant 0 : index
    %c0_35 = arith.constant 0 : index
    %25 = vector.load %arg1[%c0_32, %c2_33, %c0_34, %c0_35] : memref<1x4x296x3xf32, #tpu.memory_space<vmem>>, vector<1x1x272x3xf32>
    %26 = vector.shape_cast %25 : vector<1x1x272x3xf32> to vector<272x3xf32>
    %c1_36 = arith.constant 1 : index
    %c0_37 = arith.constant 0 : index
    %c0_38 = arith.constant 0 : index
    %c0_39 = arith.constant 0 : index
    %27 = vector.load %arg2[%c1_36, %c0_37, %c0_38, %c0_39] : memref<4x4x3x8xf32, #tpu.memory_space<vmem>>, vector<1x1x3x8xf32>
    %28 = vector.shape_cast %27 : vector<1x1x3x8xf32> to vector<3x8xf32>
    %cst_40 = arith.constant dense<0.000000e+00> : vector<272x8xf32>
    %29 = tpu.matmul %26, %28, %cst_40 {dimension_numbers = #tpu.dot_dimension_numbers<[1], [0], [0], [1], [0, 0, 1, 1], [], []>} : vector<272x3xf32>, vector<3x8xf32>, vector<272x8xf32> -> vector<272x8xf32>
    %30 = arith.addf %24, %29 : vector<272x8xf32>
    %c0_41 = arith.constant 0 : index
    %c3_42 = arith.constant 3 : index
    %c0_43 = arith.constant 0 : index
    %c0_44 = arith.constant 0 : index
    %31 = vector.load %arg1[%c0_41, %c3_42, %c0_43, %c0_44] : memref<1x4x296x3xf32, #tpu.memory_space<vmem>>, vector<1x1x272x3xf32>
    %32 = vector.shape_cast %31 : vector<1x1x272x3xf32> to vector<272x3xf32>
    %c1_45 = arith.constant 1 : index
    %c1_46 = arith.constant 1 : index
    %c0_47 = arith.constant 0 : index
    %c0_48 = arith.constant 0 : index
    %33 = vector.load %arg2[%c1_45, %c1_46, %c0_47, %c0_48] : memref<4x4x3x8xf32, #tpu.memory_space<vmem>>, vector<1x1x3x8xf32>
    %34 = vector.shape_cast %33 : vector<1x1x3x8xf32> to vector<3x8xf32>
    %cst_49 = arith.constant dense<0.000000e+00> : vector<272x8xf32>
    %35 = tpu.matmul %32, %34, %cst_49 {dimension_numbers = #tpu.dot_dimension_numbers<[1], [0], [0], [1], [0, 0, 1, 1], [], []>} : vector<272x3xf32>, vector<3x8xf32>, vector<272x8xf32> -> vector<272x8xf32>
    %36 = arith.addf %30, %35 : vector<272x8xf32>
    %c0_50 = arith.constant 0 : index
    %c2_51 = arith.constant 2 : index
    %c1_52 = arith.constant 1 : index
    %c0_53 = arith.constant 0 : index
    %37 = vector.load %arg1[%c0_50, %c2_51, %c1_52, %c0_53] : memref<1x4x296x3xf32, #tpu.memory_space<vmem>>, vector<1x1x272x3xf32>
    %38 = vector.shape_cast %37 : vector<1x1x272x3xf32> to vector<272x3xf32>
    %c1_54 = arith.constant 1 : index
    %c2_55 = arith.constant 2 : index
    %c0_56 = arith.constant 0 : index
    %c0_57 = arith.constant 0 : index
    %39 = vector.load %arg2[%c1_54, %c2_55, %c0_56, %c0_57] : memref<4x4x3x8xf32, #tpu.memory_space<vmem>>, vector<1x1x3x8xf32>
    %40 = vector.shape_cast %39 : vector<1x1x3x8xf32> to vector<3x8xf32>
    %cst_58 = arith.constant dense<0.000000e+00> : vector<272x8xf32>
    %41 = tpu.matmul %38, %40, %cst_58 {dimension_numbers = #tpu.dot_dimension_numbers<[1], [0], [0], [1], [0, 0, 1, 1], [], []>} : vector<272x3xf32>, vector<3x8xf32>, vector<272x8xf32> -> vector<272x8xf32>
    %42 = arith.addf %36, %41 : vector<272x8xf32>
    %c0_59 = arith.constant 0 : index
    %c3_60 = arith.constant 3 : index
    %c1_61 = arith.constant 1 : index
    %c0_62 = arith.constant 0 : index
    %43 = vector.load %arg1[%c0_59, %c3_60, %c1_61, %c0_62] : memref<1x4x296x3xf32, #tpu.memory_space<vmem>>, vector<1x1x272x3xf32>
    %44 = vector.shape_cast %43 : vector<1x1x272x3xf32> to vector<272x3xf32>
    %c1_63 = arith.constant 1 : index
    %c3_64 = arith.constant 3 : index
    %c0_65 = arith.constant 0 : index
    %c0_66 = arith.constant 0 : index
    %45 = vector.load %arg2[%c1_63, %c3_64, %c0_65, %c0_66] : memref<4x4x3x8xf32, #tpu.memory_space<vmem>>, vector<1x1x3x8xf32>
    %46 = vector.shape_cast %45 : vector<1x1x3x8xf32> to vector<3x8xf32>
    %cst_67 = arith.constant dense<0.000000e+00> : vector<272x8xf32>
    %47 = tpu.matmul %44, %46, %cst_67 {dimension_numbers = #tpu.dot_dimension_numbers<[1], [0], [0], [1], [0, 0, 1, 1], [], []>} : vector<272x3xf32>, vector<3x8xf32>, vector<272x8xf32> -> vector<272x8xf32>
    %48 = arith.addf %42, %47 : vector<272x8xf32>
    %c0_68 = arith.constant 0 : index
    %c0_69 = arith.constant 0 : index
    %c17 = arith.constant 17 : index
    %c0_70 = arith.constant 0 : index
    %49 = vector.load %arg1[%c0_68, %c0_69, %c17, %c0_70] : memref<1x4x296x3xf32, #tpu.memory_space<vmem>>, vector<1x1x272x3xf32>
    %50 = vector.shape_cast %49 : vector<1x1x272x3xf32> to vector<272x3xf32>
    %c2_71 = arith.constant 2 : index
    %c0_72 = arith.constant 0 : index
    %c0_73 = arith.constant 0 : index
    %c0_74 = arith.constant 0 : index
    %51 = vector.load %arg2[%c2_71, %c0_72, %c0_73, %c0_74] : memref<4x4x3x8xf32, #tpu.memory_space<vmem>>, vector<1x1x3x8xf32>
    %52 = vector.shape_cast %51 : vector<1x1x3x8xf32> to vector<3x8xf32>
    %cst_75 = arith.constant dense<0.000000e+00> : vector<272x8xf32>
    %53 = tpu.matmul %50, %52, %cst_75 {dimension_numbers = #tpu.dot_dimension_numbers<[1], [0], [0], [1], [0, 0, 1, 1], [], []>} : vector<272x3xf32>, vector<3x8xf32>, vector<272x8xf32> -> vector<272x8xf32>
    %54 = arith.addf %48, %53 : vector<272x8xf32>
    %c0_76 = arith.constant 0 : index
    %c1_77 = arith.constant 1 : index
    %c17_78 = arith.constant 17 : index
    %c0_79 = arith.constant 0 : index
    %55 = vector.load %arg1[%c0_76, %c1_77, %c17_78, %c0_79] : memref<1x4x296x3xf32, #tpu.memory_space<vmem>>, vector<1x1x272x3xf32>
    %56 = vector.shape_cast %55 : vector<1x1x272x3xf32> to vector<272x3xf32>
    %c2_80 = arith.constant 2 : index
    %c1_81 = arith.constant 1 : index
    %c0_82 = arith.constant 0 : index
    %c0_83 = arith.constant 0 : index
    %57 = vector.load %arg2[%c2_80, %c1_81, %c0_82, %c0_83] : memref<4x4x3x8xf32, #tpu.memory_space<vmem>>, vector<1x1x3x8xf32>
    %58 = vector.shape_cast %57 : vector<1x1x3x8xf32> to vector<3x8xf32>
    %cst_84 = arith.constant dense<0.000000e+00> : vector<272x8xf32>
    %59 = tpu.matmul %56, %58, %cst_84 {dimension_numbers = #tpu.dot_dimension_numbers<[1], [0], [0], [1], [0, 0, 1, 1], [], []>} : vector<272x3xf32>, vector<3x8xf32>, vector<272x8xf32> -> vector<272x8xf32>
    %60 = arith.addf %54, %59 : vector<272x8xf32>
    %c0_85 = arith.constant 0 : index
    %c0_86 = arith.constant 0 : index
    %c18 = arith.constant 18 : index
    %c0_87 = arith.constant 0 : index
    %61 = vector.load %arg1[%c0_85, %c0_86, %c18, %c0_87] : memref<1x4x296x3xf32, #tpu.memory_space<vmem>>, vector<1x1x272x3xf32>
    %62 = vector.shape_cast %61 : vector<1x1x272x3xf32> to vector<272x3xf32>
    %c2_88 = arith.constant 2 : index
    %c2_89 = arith.constant 2 : index
    %c0_90 = arith.constant 0 : index
    %c0_91 = arith.constant 0 : index
    %63 = vector.load %arg2[%c2_88, %c2_89, %c0_90, %c0_91] : memref<4x4x3x8xf32, #tpu.memory_space<vmem>>, vector<1x1x3x8xf32>
    %64 = vector.shape_cast %63 : vector<1x1x3x8xf32> to vector<3x8xf32>
    %cst_92 = arith.constant dense<0.000000e+00> : vector<272x8xf32>
    %65 = tpu.matmul %62, %64, %cst_92 {dimension_numbers = #tpu.dot_dimension_numbers<[1], [0], [0], [1], [0, 0, 1, 1], [], []>} : vector<272x3xf32>, vector<3x8xf32>, vector<272x8xf32> -> vector<272x8xf32>
    %66 = arith.addf %60, %65 : vector<272x8xf32>
    %c0_93 = arith.constant 0 : index
    %c1_94 = arith.constant 1 : index
    %c18_95 = arith.constant 18 : index
    %c0_96 = arith.constant 0 : index
    %67 = vector.load %arg1[%c0_93, %c1_94, %c18_95, %c0_96] : memref<1x4x296x3xf32, #tpu.memory_space<vmem>>, vector<1x1x272x3xf32>
    %68 = vector.shape_cast %67 : vector<1x1x272x3xf32> to vector<272x3xf32>
    %c2_97 = arith.constant 2 : index
    %c3_98 = arith.constant 3 : index
    %c0_99 = arith.constant 0 : index
    %c0_100 = arith.constant 0 : index
    %69 = vector.load %arg2[%c2_97, %c3_98, %c0_99, %c0_100] : memref<4x4x3x8xf32, #tpu.memory_space<vmem>>, vector<1x1x3x8xf32>
    %70 = vector.shape_cast %69 : vector<1x1x3x8xf32> to vector<3x8xf32>
    %cst_101 = arith.constant dense<0.000000e+00> : vector<272x8xf32>
    %71 = tpu.matmul %68, %70, %cst_101 {dimension_numbers = #tpu.dot_dimension_numbers<[1], [0], [0], [1], [0, 0, 1, 1], [], []>} : vector<272x3xf32>, vector<3x8xf32>, vector<272x8xf32> -> vector<272x8xf32>
    %72 = arith.addf %66, %71 : vector<272x8xf32>
    %c0_102 = arith.constant 0 : index
    %c2_103 = arith.constant 2 : index
    %c17_104 = arith.constant 17 : index
    %c0_105 = arith.constant 0 : index
    %73 = vector.load %arg1[%c0_102, %c2_103, %c17_104, %c0_105] : memref<1x4x296x3xf32, #tpu.memory_space<vmem>>, vector<1x1x272x3xf32>
    %74 = vector.shape_cast %73 : vector<1x1x272x3xf32> to vector<272x3xf32>
    %c3_106 = arith.constant 3 : index
    %c0_107 = arith.constant 0 : index
    %c0_108 = arith.constant 0 : index
    %c0_109 = arith.constant 0 : index
    %75 = vector.load %arg2[%c3_106, %c0_107, %c0_108, %c0_109] : memref<4x4x3x8xf32, #tpu.memory_space<vmem>>, vector<1x1x3x8xf32>
    %76 = vector.shape_cast %75 : vector<1x1x3x8xf32> to vector<3x8xf32>
    %cst_110 = arith.constant dense<0.000000e+00> : vector<272x8xf32>
    %77 = tpu.matmul %74, %76, %cst_110 {dimension_numbers = #tpu.dot_dimension_numbers<[1], [0], [0], [1], [0, 0, 1, 1], [], []>} : vector<272x3xf32>, vector<3x8xf32>, vector<272x8xf32> -> vector<272x8xf32>
    %78 = arith.addf %72, %77 : vector<272x8xf32>
    %c0_111 = arith.constant 0 : index
    %c3_112 = arith.constant 3 : index
    %c17_113 = arith.constant 17 : index
    %c0_114 = arith.constant 0 : index
    %79 = vector.load %arg1[%c0_111, %c3_112, %c17_113, %c0_114] : memref<1x4x296x3xf32, #tpu.memory_space<vmem>>, vector<1x1x272x3xf32>
    %80 = vector.shape_cast %79 : vector<1x1x272x3xf32> to vector<272x3xf32>
    %c3_115 = arith.constant 3 : index
    %c1_116 = arith.constant 1 : index
    %c0_117 = arith.constant 0 : index
    %c0_118 = arith.constant 0 : index
    %81 = vector.load %arg2[%c3_115, %c1_116, %c0_117, %c0_118] : memref<4x4x3x8xf32, #tpu.memory_space<vmem>>, vector<1x1x3x8xf32>
    %82 = vector.shape_cast %81 : vector<1x1x3x8xf32> to vector<3x8xf32>
    %cst_119 = arith.constant dense<0.000000e+00> : vector<272x8xf32>
    %83 = tpu.matmul %80, %82, %cst_119 {dimension_numbers = #tpu.dot_dimension_numbers<[1], [0], [0], [1], [0, 0, 1, 1], [], []>} : vector<272x3xf32>, vector<3x8xf32>, vector<272x8xf32> -> vector<272x8xf32>
    %84 = arith.addf %78, %83 : vector<272x8xf32>
    %c0_120 = arith.constant 0 : index
    %c2_121 = arith.constant 2 : index
    %c18_122 = arith.constant 18 : index
    %c0_123 = arith.constant 0 : index
    %85 = vector.load %arg1[%c0_120, %c2_121, %c18_122, %c0_123] : memref<1x4x296x3xf32, #tpu.memory_space<vmem>>, vector<1x1x272x3xf32>
    %86 = vector.shape_cast %85 : vector<1x1x272x3xf32> to vector<272x3xf32>
    %c3_124 = arith.constant 3 : index
    %c2_125 = arith.constant 2 : index
    %c0_126 = arith.constant 0 : index
    %c0_127 = arith.constant 0 : index
    %87 = vector.load %arg2[%c3_124, %c2_125, %c0_126, %c0_127] : memref<4x4x3x8xf32, #tpu.memory_space<vmem>>, vector<1x1x3x8xf32>
    %88 = vector.shape_cast %87 : vector<1x1x3x8xf32> to vector<3x8xf32>
    %cst_128 = arith.constant dense<0.000000e+00> : vector<272x8xf32>
    %89 = tpu.matmul %86, %88, %cst_128 {dimension_numbers = #tpu.dot_dimension_numbers<[1], [0], [0], [1], [0, 0, 1, 1], [], []>} : vector<272x3xf32>, vector<3x8xf32>, vector<272x8xf32> -> vector<272x8xf32>
    %90 = arith.addf %84, %89 : vector<272x8xf32>
    %c0_129 = arith.constant 0 : index
    %c3_130 = arith.constant 3 : index
    %c18_131 = arith.constant 18 : index
    %c0_132 = arith.constant 0 : index
    %91 = vector.load %arg1[%c0_129, %c3_130, %c18_131, %c0_132] : memref<1x4x296x3xf32, #tpu.memory_space<vmem>>, vector<1x1x272x3xf32>
    %92 = vector.shape_cast %91 : vector<1x1x272x3xf32> to vector<272x3xf32>
    %c3_133 = arith.constant 3 : index
    %c3_134 = arith.constant 3 : index
    %c0_135 = arith.constant 0 : index
    %c0_136 = arith.constant 0 : index
    %93 = vector.load %arg2[%c3_133, %c3_134, %c0_135, %c0_136] : memref<4x4x3x8xf32, #tpu.memory_space<vmem>>, vector<1x1x3x8xf32>
    %94 = vector.shape_cast %93 : vector<1x1x3x8xf32> to vector<3x8xf32>
    %cst_137 = arith.constant dense<0.000000e+00> : vector<272x8xf32>
    %95 = tpu.matmul %92, %94, %cst_137 {dimension_numbers = #tpu.dot_dimension_numbers<[1], [0], [0], [1], [0, 0, 1, 1], [], []>} : vector<272x3xf32>, vector<3x8xf32>, vector<272x8xf32> -> vector<272x8xf32>
    %96 = arith.addf %90, %95 : vector<272x8xf32>
    %c0_138 = arith.constant 0 : index
    %c0_139 = arith.constant 0 : index
    %c0_140 = arith.constant 0 : index
    %97 = vector.load %arg3[%c0_138, %c0_139, %c0_140] : memref<1x272x8xf32, #tpu.memory_space<vmem>>, vector<1x272x8xf32>
    %98 = vector.shape_cast %97 : vector<1x272x8xf32> to vector<272x8xf32>
    %99 = vector.shape_cast %96 : vector<272x8xf32> to vector<1x272x8xf32>
    tpu.vector_store %arg3[%c0_138, %c0_139, %c0_140], %99 {strides = array<i32>} : memref<1x272x8xf32, #tpu.memory_space<vmem>>, vector<1x272x8xf32>,
    return
  }
  func.func @transform_0(%arg0: i32) -> (i32, i32, i32, i32) {
    %c0_i32 = arith.constant 0 : i32
    %c0_i32_0 = arith.constant 0 : i32
    %c0_i32_1 = arith.constant 0 : i32
    %c0_i32_2 = arith.constant 0 : i32
    return %arg0, %c0_i32, %c0_i32_0, %c0_i32_1 : i32, i32, i32, i32
  }
  func.func @transform_1(%arg0: i32) -> (i32, i32, i32, i32) {
    %c0_i32 = arith.constant 0 : i32
    %c0_i32_0 = arith.constant 0 : i32
    %c0_i32_1 = arith.constant 0 : i32
    %c0_i32_2 = arith.constant 0 : i32
    %c0_i32_3 = arith.constant 0 : i32
    return %c0_i32, %c0_i32_0, %c0_i32_1, %c0_i32_2 : i32, i32, i32, i32
  }
  func.func @transform_2(%arg0: i32) -> (i32, i32, i32) {
    %c0_i32 = arith.constant 0 : i32
    %c0_i32_0 = arith.constant 0 : i32
    %c0_i32_1 = arith.constant 0 : i32
    return %arg0, %c0_i32, %c0_i32_0 : i32, i32, i32
  }
}

</mosaic_0001>

<bundles_post_ra>
// kernel: tpu_custom_call.1
= control target key start
LH: loop header
LB: loop body
LE: loop exit
PB: predicated region body
PF: predicated region fallthrough
CT: control target
= control target key end

     0   :  { %s9673_s9 = smov 0   ;;  %s11366_s0 = inlined_call_operand.vmem [shape: f32[2,4,296,3], index: 0, kind: input, shape index: {}]   ;;  %s11367_s1 = inlined_call_operand.vmem [shape: f32[4,4,3,8], index: 1, kind: input, shape index: {}]   ;;  %s11368_s2 = inlined_call_operand.vmem [shape: f32[2,272,8], index: 2, kind: output, shape index: {}]  }
   0x1 LB: > { %s6730_s10 = sadd.s32 4294967295, %s9656_s9   ;;  %p6734_p0 = scmp.ge.s32.totalorder %s9656_s9, 1  ;;  %s9656_s9 = sphi %s9673_s9, %s12_s9  }
   0x2   : > { %p112_p1 = scmp.lt.s32.totalorder %s9656_s9, 3 }
   0x4   : > { %p113_p2 = pnand %p6734_p0, %p112_p1 }
   0x6   : > { %116 = sbr.rel (%p113_p2) target bundleno = 777 (0x309), region = 28 }
   0xd   : > { %v6771_v0 = vld [vmem:[%s11367_s1 + $0x4] sm:$0x7]  ;;  %vm319_vm0 = vcmask 1042432   ;;  %v7228_v1 = vld [vmem:[%s11367_s1 + $0x20] sm:$0x7]  ;;  %p134_p3 = scmp.lt.s32.totalorder %s6730_s10, 1 }
   0xe   : > { %8282 = vmatprep.subr.msk.mxu1 %vm319_vm0, %v6771_v0  ;;  %8706 = vmatprep.subr.msk.mxu0 %vm319_vm0, %v7228_v1  ;;  %v178_v2 = vld [vmem:[%s11367_s1] sm:$0x7]  ;;  %v7298_v3 = vld [vmem:[%s11367_s1 + $0x24] sm:$0x7]  ;;  %vm216_vm1 = vcmask 23552   ;;  %vm6640_vm2 = vcmask 64512  }
   0xf   : > { %8283 = vmatpush3.msk.msra.mxu1 %vm319_vm0, %v6771_v0  ;;  %8707 = vmatpush3.msk.msra.mxu0 %vm319_vm0, %v7228_v1  ;;  %s11433_s10 = smov (!%p134_p3, %s6730_s10), 1  ;;  %v9728_v10 = vld [vmem:[%s11367_s1 + $0x8] sm:$0x7] }
  0x10   : > { %8335 = vmatprep.subr.msk.mxu1 %vm319_vm0, %v178_v2  ;;  %8759 = vmatprep.subr.msk.mxu0 %vm319_vm0, %v7298_v3  ;;  %s9640_s19 = smul.u32 1184, %s11433_s10  ;;  %v9733_v11 = vld [vmem:[%s11367_s1 + $0x28] sm:$0x7] }
  0x11   : > { %s9641_s21 = smul.u32 272, %s11433_s10 }
  0x12   : > { %s9705_s22 = scalar_lea.vmem %s11366_s0, %s9640_s19 }
  0x13   : > { %v6737_v4 = vld [vmem:[%s9705_s22 + $0x128] sm:$0xff]  ;;  %v9709_v5 = vld [vmem:[%s9705_s22 + $0x11] sm:$0xff]  ;;  %v9716_v7 = vld [vmem:[%s9705_s22 + $0x19] sm:$0xff]  ;;  %s11293_s25 = scalar_lea.vmem %s11368_s2, %s9641_s21 }
  0x14   : > { %v6738_v6 = vld [vmem:[%s9705_s22 + $0x130] sm:$0xff]  ;;  %8284 = vmatprep.mubr.msk.f32.mxu1 %vm216_vm1, %v6737_v4  ;;  %8708 = vmatprep.mubr.msk.f32.mxu0 %vm216_vm1, %v9709_v5  ;;  %v6739_v8 = vld [vmem:[%s9705_s22 + $0x138] sm:$0xff]  ;;  %v9720_v9 = vld [vmem:[%s9705_s22 + $0x21] sm:$0xff] }
  0x15   : > { %8285 = vmatmul.mubr.msk.f32.vlgmr.msra.gmra.mrb[0].mxu1 %vm216_vm1, %v6738_v6  ;;  %8709 = vmatmul.mubr.msk.f32.vlgmr.msra.gmra.mrb[0].mxu0 %vm216_vm1, %v9716_v7  ;;  %v6740_v12 = vld [vmem:[%s9705_s22 + $0x140] sm:$0xff]  ;;  %v9739_v13 = vld [vmem:[%s9705_s22 + $0x29] sm:$0xff]  ;;  %v9746_v15 = vld [vmem:[%s9705_s22 + $0x31] sm:$0xff] }
  0x16   : > { %8336 = vmatpush3.msk.msra.mxu1 %vm319_vm0, %v178_v2  ;;  %8760 = vmatpush3.msk.msra.mxu0 %vm319_vm0, %v7298_v3  ;;  %v6741_v14 = vld [vmem:[%s9705_s22 + $0x148] sm:$0xff]  ;;  %v6742_v16 = vld [vmem:[%s9705_s22 + $0x150] sm:$0xff]  ;;  %v9760_v17 = vld [vmem:[%s9705_s22 + $0x39] sm:$0xff] }
  0x17   : > { %8287 = vmatprep.mubr.msk.f32.mxu1 %vm216_vm1, %v6739_v8  ;;  %8711 = vmatprep.mubr.msk.f32.mxu0 %vm216_vm1, %v9720_v9  ;;  %v6743_v18 = vld [vmem:[%s9705_s22 + $0x158] sm:$0xff]  ;;  %v9764_v19 = vld [vmem:[%s9705_s22 + $0x41] sm:$0xff]  ;;  %v9774_v21 = vld [vmem:[%s9705_s22 + $0x49] sm:$0xff] }
  0x18   : > { %8388 = vmatprep.subr.msk.mxu1 %vm319_vm0, %v9728_v10  ;;  %8812 = vmatprep.subr.msk.mxu0 %vm319_vm0, %v9733_v11  ;;  %v6744_v20 = vld [vmem:[%s9705_s22 + $0x160] sm:$0xff]  ;;  %v6745_v22 = vld [vmem:[%s9705_s22 + $0x168] sm:$0xff]  ;;  %v9778_v23 = vld [vmem:[%s9705_s22 + $0x51] sm:$0xff] }
  0x19   : > { %8288 = vmatmul.mubr.msk.f32.gmra.mrb[2].mxu1 %vm216_vm1, %v6740_v12  ;;  %8712 = vmatmul.mubr.msk.f32.gmra.mrb[2].mxu0 %vm216_vm1, %v9739_v13  ;;  %v6746_v24 = vld [vmem:[%s9705_s22 + $0x170] sm:$0xff]  ;;  %v9788_v25 = vld [vmem:[%s9705_s22 + $0x59] sm:$0xff]  ;;  %v9792_v27 = vld [vmem:[%s9705_s22 + $0x61] sm:$0xff] }
  0x1a   : > { %8290 = vmatprep.mubr.msk.f32.mxu1 %vm216_vm1, %v6741_v14  ;;  %8714 = vmatprep.mubr.msk.f32.mxu0 %vm216_vm1, %v9746_v15  ;;  %v6747_v26 = vld [vmem:[%s9705_s22 + $0x178] sm:$0xff]  ;;  %v6748_v28 = vld [vmem:[%s9705_s22 + $0x180] sm:$0xff]  ;;  %v9802_v29 = vld [vmem:[%s9705_s22 + $0x69] sm:$0xff] }
  0x1b   : > { %v6749_v30 = vld [vmem:[%s9705_s22 + $0x188] sm:$0xff]  ;;  %v9806_v31 = vld [vmem:[%s9705_s22 + $0x71] sm:$0xff]  ;;  %v9816_v33 = vld [vmem:[%s9705_s22 + $0x79] sm:$0xff] }
  0x1c   : > { %v6750_v32 = vld [vmem:[%s9705_s22 + $0x190] sm:$0xff]  ;;  %v6751_v34 = vld [vmem:[%s9705_s22 + $0x198] sm:$0xff]  ;;  %v9820_v35 = vld [vmem:[%s9705_s22 + $0x81] sm:$0xff] }
  0x1d   : > { %8291 = vmatmul.mubr.msk.f32.gmra.mrb[4].mxu1 %vm216_vm1, %v6742_v16  ;;  %8715 = vmatmul.mubr.msk.f32.gmra.mrb[4].mxu0 %vm216_vm1, %v9760_v17  ;;  %v6752_v36 = vld [vmem:[%s9705_s22 + $0x1a0] sm:$0xff]  ;;  %v9830_v37 = vld [vmem:[%s9705_s22 + $0x89] sm:$0xff]  ;;  %v9834_v39 = vld [vmem:[%s9705_s22 + $0x91] sm:$0xff] }
  0x1e   : > { %8293 = vmatprep.mubr.msk.f32.mxu1 %vm216_vm1, %v6743_v18  ;;  %8717 = vmatprep.mubr.msk.f32.mxu0 %vm216_vm1, %v9764_v19  ;;  %v6753_v38 = vld [vmem:[%s9705_s22 + $0x1a8] sm:$0xff]  ;;  %v6754_v40 = vld [vmem:[%s9705_s22 + $0x1b0] sm:$0xff]  ;;  %v9844_v41 = vld [vmem:[%s9705_s22 + $0x99] sm:$0xff] }
  0x1f   : > { %v6755_v42 = vld [vmem:[%s9705_s22 + $0x1b8] sm:$0xff]  ;;  %v9848_v43 = vld [vmem:[%s9705_s22 + $0xa1] sm:$0xff]  ;;  %v9858_v45 = vld [vmem:[%s9705_s22 + $0xa9] sm:$0xff] }
  0x20   : > { %v6756_v44 = vld [vmem:[%s9705_s22 + $0x1c0] sm:$0xff]  ;;  %v6757_v46 = vld [vmem:[%s9705_s22 + $0x1c8] sm:$0xff]  ;;  %v9862_v47 = vld [vmem:[%s9705_s22 + $0xb1] sm:$0xff] }
  0x21   : > { %8294 = vmatmul.mubr.msk.f32.gmra.mrb[6].mxu1 %vm216_vm1, %v6744_v20  ;;  %8718 = vmatmul.mubr.msk.f32.gmra.mrb[6].mxu0 %vm216_vm1, %v9774_v21  ;;  %v6758_v48 = vld [vmem:[%s9705_s22 + $0x1d0] sm:$0xff]  ;;  %v9872_v49 = vld [vmem:[%s9705_s22 + $0xb9] sm:$0xff]  ;;  %v9876_v51 = vld [vmem:[%s9705_s22 + $0xc1] sm:$0xff] }
  0x22   : > { %8296 = vmatprep.mubr.msk.f32.mxu1 %vm216_vm1, %v6745_v22  ;;  %8720 = vmatprep.mubr.msk.f32.mxu0 %vm216_vm1, %v9778_v23  ;;  %v6759_v50 = vld [vmem:[%s9705_s22 + $0x1d8] sm:$0xff]  ;;  %v6760_v52 = vld [vmem:[%s9705_s22 + $0x1e0] sm:$0xff]  ;;  %v9886_v53 = vld [vmem:[%s9705_s22 + $0xc9] sm:$0xff] }
  0x23   : > { %v6761_v54 = vld [vmem:[%s9705_s22 + $0x1e8] sm:$0xff]  ;;  %v9890_v55 = vld [vmem:[%s9705_s22 + $0xd1] sm:$0xff]  ;;  %v9900_v57 = vld [vmem:[%s9705_s22 + $0xd9] sm:$0xff] }
  0x24   : > { %v6762_v56 = vld [vmem:[%s9705_s22 + $0x1f0] sm:$0xff]  ;;  %v6763_v58 = vld [vmem:[%s9705_s22 + $0x1f8] sm:$0xff]  ;;  %v9904_v59 = vld [vmem:[%s9705_s22 + $0xe1] sm:$0xff] }
  0x25   : > { %8297 = vmatmul.mubr.msk.f32.gmra.mrb[8].mxu1 %vm216_vm1, %v6746_v24  ;;  %8721 = vmatmul.mubr.msk.f32.gmra.mrb[8].mxu0 %vm216_vm1, %v9788_v25  ;;  %v6764_v60 = vld [vmem:[%s9705_s22 + $0x200] sm:$0xff]  ;;  %v9914_v61 = vld [vmem:[%s9705_s22 + $0xe9] sm:$0xff]  ;;  %v9918_v63 = vld [vmem:[%s9705_s22 + $0xf1] sm:$0xff] }
  0x26   : > { %8299 = vmatprep.mubr.msk.f32.mxu1 %vm216_vm1, %v6747_v26  ;;  %8723 = vmatprep.mubr.msk.f32.mxu0 %vm216_vm1, %v9792_v27  ;;  %v6765_v62 = vld [vmem:[%s9705_s22 + $0x208] sm:$0xff]  ;;  %v6766_v0 = vld [vmem:[%s9705_s22 + $0x210] sm:$0xff]  ;;  %v9928_v1 = vld [vmem:[%s9705_s22 + $0xf9] sm:$0xff] }
  0x27   : > { %v6767_v2 = vld [vmem:[%s9705_s22 + $0x218] sm:$0xff]  ;;  %v9932_v3 = vld [vmem:[%s9705_s22 + $0x101] sm:$0xff]  ;;  %v9942_v6 = vld [vmem:[%s9705_s22 + $0x109] sm:$0xff] }
  0x28   : > { %v6768_v4 = vld [vmem:[%s9705_s22 + $0x220] sm:$0xff]  ;;  %v6769_v8 = vld [vmem:[%s9705_s22 + $0x228] sm:$0xff]  ;;  %v3392_v12 = vld [vmem:[%s9705_s22 + $0x111] sm:$0xff] }
  0x29   : > { %8300 = vmatmul.mubr.msk.f32.gmra.mrb[10].mxu1 %vm216_vm1, %v6748_v28  ;;  %8724 = vmatmul.mubr.msk.f32.gmra.mrb[10].mxu0 %vm216_vm1, %v9802_v29  ;;  %v6770_v14 = vld [vmem:[%s9705_s22 + $0x230] sm:$0xff]  ;;  %v3393_v16 = vld [vmem:[%s9705_s22 + $0x119] sm:$0xff]  ;;  %v145_v22 = vld [vmem:[%s9705_s22 + $0x8] sm:$0xff] }
  0x2a   : > { %8302 = vmatprep.mubr.msk.f32.mxu1 %vm216_vm1, %v6749_v30  ;;  %8726 = vmatprep.mubr.msk.f32.mxu0 %vm216_vm1, %v9806_v31  ;;  %v144_v18 = vld [vmem:[%s9705_s22] sm:$0xff]  ;;  %v146_v26 = vld [vmem:[%s9705_s22 + $0x10] sm:$0xff]  ;;  %v9976_v30 = vld [vmem:[%s11367_s1 + $0xc] sm:$0x7] }
  0x2b   : > { %v9955_v20 = vld [vmem:[%s9705_s22 + $0x139] sm:$0xff]  ;;  %v9964_v24 = vld [vmem:[%s9705_s22 + $0x141] sm:$0xff]  ;;  %v9968_v28 = vld [vmem:[%s9705_s22 + $0x149] sm:$0xff] }
  0x2d   : > { %8303 = vmatmul.mubr.msk.f32.gmra.mrb[12].mxu1 %vm216_vm1, %v6750_v32  ;;  %8727 = vmatmul.mubr.msk.f32.gmra.mrb[12].mxu0 %vm216_vm1, %v9816_v33  ;;  %v9981_v32 = vld [vmem:[%s11367_s1 + $0x2c] sm:$0x7] }
  0x2e   : > { %8305 = vmatprep.mubr.msk.f32.mxu1 %vm216_vm1, %v6751_v34  ;;  %8729 = vmatprep.mubr.msk.f32.mxu0 %vm216_vm1, %v9820_v35  ;;  %v147_v34 = vld [vmem:[%s9705_s22 + $0x18] sm:$0xff] }
  0x31   : > { %8306 = vmatmul.mubr.msk.f32.gmra.mrb[14].mxu1 %vm216_vm1, %v6752_v36  ;;  %8730 = vmatmul.mubr.msk.f32.gmra.mrb[14].mxu0 %vm216_vm1, %v9830_v37  ;;  %v9989_v36 = vld [vmem:[%s9705_s22 + $0x151] sm:$0xff] }
  0x32   : > { %8308 = vmatprep.mubr.msk.f32.mxu1 %vm216_vm1, %v6753_v38  ;;  %8732 = vmatprep.mubr.msk.f32.mxu0 %vm216_vm1, %v9834_v39  ;;  %v148_v38 = vld [vmem:[%s9705_s22 + $0x20] sm:$0xff] }
  0x35   : > { %8309 = vmatmul.mubr.msk.f32.gmra.mrb[16].mxu1 %vm216_vm1, %v6754_v40  ;;  %8733 = vmatmul.mubr.msk.f32.gmra.mrb[16].mxu0 %vm216_vm1, %v9844_v41  ;;  %v9996_v40 = vld [vmem:[%s9705_s22 + $0x159] sm:$0xff] }
  0x36   : > { %8311 = vmatprep.mubr.msk.f32.mxu1 %vm216_vm1, %v6755_v42  ;;  %8735 = vmatprep.mubr.msk.f32.mxu0 %vm216_vm1, %v9848_v43  ;;  %v150_v42 = vld [vmem:[%s9705_s22 + $0x30] sm:$0xff] }
  0x39   : > { %8312 = vmatmul.mubr.msk.f32.gmra.mrb[18].mxu1 %vm216_vm1, %v6756_v44  ;;  %8736 = vmatmul.mubr.msk.f32.gmra.mrb[18].mxu0 %vm216_vm1, %v9858_v45  ;;  %v10014_v44 = vld [vmem:[%s9705_s22 + $0x169] sm:$0xff] }
  0x3a   : > { %8314 = vmatprep.mubr.msk.f32.mxu1 %vm216_vm1, %v6757_v46  ;;  %8738 = vmatprep.mubr.msk.f32.mxu0 %vm216_vm1, %v9862_v47  ;;  %v151_v46 = vld [vmem:[%s9705_s22 + $0x38] sm:$0xff] }
  0x3d   : > { %8315 = vmatmul.mubr.msk.f32.gmra.mrb[20].mxu1 %vm216_vm1, %v6758_v48  ;;  %8739 = vmatmul.mubr.msk.f32.gmra.mrb[20].mxu0 %vm216_vm1, %v9872_v49  ;;  %v10024_v48 = vld [vmem:[%s9705_s22 + $0x171] sm:$0xff] }
  0x3e   : > { %8317 = vmatprep.mubr.msk.f32.mxu1 %vm216_vm1, %v6759_v50  ;;  %8741 = vmatprep.mubr.msk.f32.mxu0 %vm216_vm1, %v9876_v51  ;;  %v152_v50 = vld [vmem:[%s9705_s22 + $0x40] sm:$0xff] }
  0x41   : > { %8318 = vmatmul.mubr.msk.f32.gmra.mrb[22].mxu1 %vm216_vm1, %v6760_v52  ;;  %8742 = vmatmul.mubr.msk.f32.gmra.mrb[22].mxu0 %vm216_vm1, %v9886_v53  ;;  %v10028_v52 = vld [vmem:[%s9705_s22 + $0x179] sm:$0xff] }
  0x42   : > { %8320 = vmatprep.mubr.msk.f32.mxu1 %vm216_vm1, %v6761_v54  ;;  %8744 = vmatprep.mubr.msk.f32.mxu0 %vm216_vm1, %v9890_v55  ;;  %v153_v54 = vld [vmem:[%s9705_s22 + $0x48] sm:$0xff] }
  0x45   : > { %8321 = vmatmul.mubr.msk.f32.gmra.mrb[24].mxu1 %vm216_vm1, %v6762_v56  ;;  %8745 = vmatmul.mubr.msk.f32.gmra.mrb[24].mxu0 %vm216_vm1, %v9900_v57  ;;  %v10038_v56 = vld [vmem:[%s9705_s22 + $0x181] sm:$0xff] }
  0x46   : > { %8323 = vmatprep.mubr.msk.f32.mxu1 %vm216_vm1, %v6763_v58  ;;  %8747 = vmatprep.mubr.msk.f32.mxu0 %vm216_vm1, %v9904_v59  ;;  %v154_v58 = vld [vmem:[%s9705_s22 + $0x50] sm:$0xff] }
  0x49   : > { %8324 = vmatmul.mubr.msk.f32.gmra.mrb[26].mxu1 %vm216_vm1, %v6764_v60  ;;  %8748 = vmatmul.mubr.msk.f32.gmra.mrb[26].mxu0 %vm216_vm1, %v9914_v61  ;;  %v10042_v60 = vld [vmem:[%s9705_s22 + $0x189] sm:$0xff] }
  0x4a   : > { %8326 = vmatprep.mubr.msk.f32.mxu1 %vm216_vm1, %v6765_v62  ;;  %8750 = vmatprep.mubr.msk.f32.mxu0 %vm216_vm1, %v9918_v63  ;;  %v155_v62 = vld [vmem:[%s9705_s22 + $0x58] sm:$0xff] }
  0x4d   : > { %8327 = vmatmul.mubr.msk.f32.gmra.mrb[28].mxu1 %vm216_vm1, %v6766_v0  ;;  %8751 = vmatmul.mubr.msk.f32.gmra.mrb[28].mxu0 %vm216_vm1, %v9928_v1  ;;  %v10052_v0 = vld [vmem:[%s9705_s22 + $0x191] sm:$0xff] }
  0x4e   : > { %8329 = vmatprep.mubr.msk.f32.mxu1 %vm216_vm1, %v6767_v2  ;;  %8753 = vmatprep.mubr.msk.f32.mxu0 %vm216_vm1, %v9932_v3  ;;  %v156_v2 = vld [vmem:[%s9705_s22 + $0x60] sm:$0xff] }
  0x51   : > { %8330 = vmatmul.mubr.msk.f32.gmra.mrb[30].mxu1 %vm216_vm1, %v6768_v4  ;;  %8754 = vmatmul.mubr.msk.f32.gmra.mrb[30].mxu0 %vm216_vm1, %v9942_v6  ;;  %v10056_v4 = vld [vmem:[%s9705_s22 + $0x199] sm:$0xff] }
  0x52   : > { %8332 = vmatprep.mubr.msk.f32.mxu1 %vm216_vm1, %v6769_v8  ;;  %8756 = vmatprep.mubr.msk.f32.mxu0 %vm216_vm1, %v3392_v12  ;;  %v157_v8 = vld [vmem:[%s9705_s22 + $0x68] sm:$0xff] }
  0x53   : > { %v10066_v12 = vld [vmem:[%s9705_s22 + $0x1a1] sm:$0xff] }
  0x55   : > { %8333 = vmatmul.mubr.msk.f32.gmra.mrb[32].mxu1 %vm216_vm1, %v6770_v14  ;;  %8757 = vmatmul.mubr.msk.f32.gmra.mrb[32].mxu0 %vm216_vm1, %v3393_v16  ;;  %v158_v14 = vld [vmem:[%s9705_s22 + $0x70] sm:$0xff] }
  0x56   : > { %8337 = vmatprep.mubr.msk.f32.mxu1 %vm216_vm1, %v144_v18  ;;  %8761 = vmatprep.mubr.msk.f32.mxu0 %vm216_vm1, %v9955_v20  ;;  %v10070_v16 = vld [vmem:[%s9705_s22 + $0x1a9] sm:$0xff]  ;;  %v159_v18 = vld [vmem:[%s9705_s22 + $0x78] sm:$0xff] }
  0x59   : > { %8338 = vmatmul.mubr.msk.f32.vlgmr.msra.gmra.mrb[0].mxu1 %vm216_vm1, %v145_v22  ;;  %8762 = vmatmul.mubr.msk.f32.vlgmr.msra.gmra.mrb[0].mxu0 %vm216_vm1, %v9964_v24  ;;  %v10080_v22 = vld [vmem:[%s9705_s22 + $0x1b1] sm:$0xff] }
  0x5a   : > { %8389 = vmatpush3.msk.msra.mxu1 %vm319_vm0, %v9728_v10  ;;  %8813 = vmatpush3.msk.msra.mxu0 %vm319_vm0, %v9733_v11  ;;  %v149_v10 = vld [vmem:[%s9705_s22 + $0x28] sm:$0xff] }
  0x5b   : > { %8340 = vmatprep.mubr.msk.f32.mxu1 %vm216_vm1, %v146_v26  ;;  %8764 = vmatprep.mubr.msk.f32.mxu0 %vm216_vm1, %v9968_v28  ;;  %v10010_v11 = vld [vmem:[%s9705_s22 + $0x161] sm:$0xff] }
  0x5c   : > { %8441 = vmatprep.subr.msk.mxu1 %vm319_vm0, %v9976_v30  ;;  %8865 = vmatprep.subr.msk.mxu0 %vm319_vm0, %v9981_v32  ;;  %v160_v26 = vld [vmem:[%s9705_s22 + $0x80] sm:$0xff] }
  0x5d   : > { %8341 = vmatmul.mubr.msk.f32.gmra.mrb[2].mxu1 %vm216_vm1, %v147_v34  ;;  %8765 = vmatmul.mubr.msk.f32.gmra.mrb[2].mxu0 %vm216_vm1, %v9989_v36  ;;  %v10084_v34 = vld [vmem:[%s9705_s22 + $0x1b9] sm:$0xff] }
  0x5e   : > { %8343 = vmatprep.mubr.msk.f32.mxu1 %vm216_vm1, %v148_v38  ;;  %8767 = vmatprep.mubr.msk.f32.mxu0 %vm216_vm1, %v9996_v40  ;;  %v161_v38 = vld [vmem:[%s9705_s22 + $0x88] sm:$0xff] }
  0x61   : > { %8344 = vmatmul.mubr.msk.f32.gmra.mrb[4].mxu1 %vm216_vm1, %v149_v10  ;;  %8768 = vmatmul.mubr.msk.f32.gmra.mrb[4].mxu0 %vm216_vm1, %v10010_v11  ;;  %v10094_v10 = vld [vmem:[%s9705_s22 + $0x1c1] sm:$0xff] }
  0x62   : > { %8346 = vmatprep.mubr.msk.f32.mxu1 %vm216_vm1, %v150_v42  ;;  %8770 = vmatprep.mubr.msk.f32.mxu0 %vm216_vm1, %v10014_v44  ;;  %v162_v42 = vld [vmem:[%s9705_s22 + $0x90] sm:$0xff] }
  0x65   : > { %8347 = vmatmul.mubr.msk.f32.gmra.mrb[6].mxu1 %vm216_vm1, %v151_v46  ;;  %8771 = vmatmul.mubr.msk.f32.gmra.mrb[6].mxu0 %vm216_vm1, %v10024_v48  ;;  %v10098_v46 = vld [vmem:[%s9705_s22 + $0x1c9] sm:$0xff] }
  0x66   : > { %8349 = vmatprep.mubr.msk.f32.mxu1 %vm216_vm1, %v152_v50  ;;  %8773 = vmatprep.mubr.msk.f32.mxu0 %vm216_vm1, %v10028_v52  ;;  %v163_v50 = vld [vmem:[%s9705_s22 + $0x98] sm:$0xff] }
  0x69   : > { %8350 = vmatmul.mubr.msk.f32.gmra.mrb[8].mxu1 %vm216_vm1, %v153_v54  ;;  %8774 = vmatmul.mubr.msk.f32.gmra.mrb[8].mxu0 %vm216_vm1, %v10038_v56  ;;  %v10108_v54 = vld [vmem:[%s9705_s22 + $0x1d1] sm:$0xff] }
  0x6a   : > { %8352 = vmatprep.mubr.msk.f32.mxu1 %vm216_vm1, %v154_v58  ;;  %8776 = vmatprep.mubr.msk.f32.mxu0 %vm216_vm1, %v10042_v60  ;;  %v164_v58 = vld [vmem:[%s9705_s22 + $0xa0] sm:$0xff] }
  0x6d   : > { %8353 = vmatmul.mubr.msk.f32.gmra.mrb[10].mxu1 %vm216_vm1, %v155_v62  ;;  %8777 = vmatmul.mubr.msk.f32.gmra.mrb[10].mxu0 %vm216_vm1, %v10052_v0  ;;  %v10112_v62 = vld [vmem:[%s9705_s22 + $0x1d9] sm:$0xff] }
  0x6e   : > { %8355 = vmatprep.mubr.msk.f32.mxu1 %vm216_vm1, %v156_v2  ;;  %8779 = vmatprep.mubr.msk.f32.mxu0 %vm216_vm1, %v10056_v4  ;;  %v165_v2 = vld [vmem:[%s9705_s22 + $0xa8] sm:$0xff] }
  0x71   : > { %8356 = vmatmul.mubr.msk.f32.gmra.mrb[12].mxu1 %vm216_vm1, %v157_v8  ;;  %8780 = vmatmul.mubr.msk.f32.gmra.mrb[12].mxu0 %vm216_vm1, %v10066_v12  ;;  %v10122_v8 = vld [vmem:[%s9705_s22 + $0x1e1] sm:$0xff] }
  0x72   : > { %8358 = vmatprep.mubr.msk.f32.mxu1 %vm216_vm1, %v158_v14  ;;  %8782 = vmatprep.mubr.msk.f32.mxu0 %vm216_vm1, %v10070_v16  ;;  %11390 = vst [vmem:[#allocation2_spill] sm:$0xff] %v10122_v8  ;;  %v166_v14 = vld [vmem:[%s9705_s22 + $0xb0] sm:$0xff] }
  0x75   : > { %8359 = vmatmul.mubr.msk.f32.gmra.mrb[14].mxu1 %vm216_vm1, %v159_v18  ;;  %8783 = vmatmul.mubr.msk.f32.gmra.mrb[14].mxu0 %vm216_vm1, %v10080_v22  ;;  %v10126_v18 = vld [vmem:[%s9705_s22 + $0x1e9] sm:$0xff] }
  0x76   : > { %8361 = vmatprep.mubr.msk.f32.mxu1 %vm216_vm1, %v160_v26  ;;  %8785 = vmatprep.mubr.msk.f32.mxu0 %vm216_vm1, %v10084_v34  ;;  %11391 = vst [vmem:[#allocation3_spill] sm:$0xff] %v10126_v18  ;;  %v167_v26 = vld [vmem:[%s9705_s22 + $0xb8] sm:$0xff] }
  0x79   : > { %8362 = vmatmul.mubr.msk.f32.gmra.mrb[16].mxu1 %vm216_vm1, %v161_v38  ;;  %8786 = vmatmul.mubr.msk.f32.gmra.mrb[16].mxu0 %vm216_vm1, %v10094_v10  ;;  %v10136_v38 = vld [vmem:[%s9705_s22 + $0x1f1] sm:$0xff] }
  0x7a   : > { %8364 = vmatprep.mubr.msk.f32.mxu1 %vm216_vm1, %v162_v42  ;;  %8788 = vmatprep.mubr.msk.f32.mxu0 %vm216_vm1, %v10098_v46  ;;  %11392 = vst [vmem:[#allocation4_spill] sm:$0xff] %v10136_v38  ;;  %v168_v42 = vld [vmem:[%s9705_s22 + $0xc0] sm:$0xff] }
  0x7d   : > { %8365 = vmatmul.mubr.msk.f32.gmra.mrb[18].mxu1 %vm216_vm1, %v163_v50  ;;  %8789 = vmatmul.mubr.msk.f32.gmra.mrb[18].mxu0 %vm216_vm1, %v10108_v54  ;;  %v10140_v50 = vld [vmem:[%s9705_s22 + $0x1f9] sm:$0xff] }
  0x7e   : > { %8367 = vmatprep.mubr.msk.f32.mxu1 %vm216_vm1, %v164_v58  ;;  %8791 = vmatprep.mubr.msk.f32.mxu0 %vm216_vm1, %v10112_v62  ;;  %11393 = vst [vmem:[#allocation5_spill] sm:$0xff] %v10140_v50  ;;  %v169_v58 = vld [vmem:[%s9705_s22 + $0xc8] sm:$0xff] }
  0x81   : > { %8368 = vmatmul.mubr.msk.f32.gmra.mrb[20].mxu1 %vm216_vm1, %v165_v2  ;;  %8792 = vmatmul.mubr.msk.f32.gmra.mrb[20].mxu0 %vm216_vm1, %v10122_v8  ;;  %v10150_v2 = vld [vmem:[%s9705_s22 + $0x201] sm:$0xff] }
  0x82   : > { %8370 = vmatprep.mubr.msk.f32.mxu1 %vm216_vm1, %v166_v14  ;;  %8794 = vmatprep.mubr.msk.f32.mxu0 %vm216_vm1, %v10126_v18  ;;  %11394 = vst [vmem:[#allocation6_spill] sm:$0xff] %v10150_v2  ;;  %v170_v14 = vld [vmem:[%s9705_s22 + $0xd0] sm:$0xff]  ;;  %v4182_v8 = vld [vmem:[%s9705_s22 + $0x22] sm:$0xff] }
  0x83   : > { %v10154_v18 = vld [vmem:[%s9705_s22 + $0x209] sm:$0xff] }
  0x84   : > { %11395 = vst [vmem:[#allocation7_spill] sm:$0xff] %v10154_v18 }
  0x85   : > { %8371 = vmatmul.mubr.msk.f32.gmra.mrb[22].mxu1 %vm216_vm1, %v167_v26  ;;  %8795 = vmatmul.mubr.msk.f32.gmra.mrb[22].mxu0 %vm216_vm1, %v10136_v38  ;;  %v171_v26 = vld [vmem:[%s9705_s22 + $0xd8] sm:$0xff] }
  0x86   : > { %8373 = vmatprep.mubr.msk.f32.mxu1 %vm216_vm1, %v168_v42  ;;  %8797 = vmatprep.mubr.msk.f32.mxu0 %vm216_vm1, %v10140_v50  ;;  %v10164_v42 = vld [vmem:[%s9705_s22 + $0x211] sm:$0xff]  ;;  %v172_v50 = vld [vmem:[%s9705_s22 + $0xe0] sm:$0xff] }
  0x87   : > { %11396 = vst [vmem:[#allocation8_spill] sm:$0xff] %v10164_v42  ;;  %v10168_v38 = vld [vmem:[%s9705_s22 + $0x219] sm:$0xff] }
  0x88   : > { %11397 = vst [vmem:[#allocation9_spill] sm:$0xff] %v10168_v38 }
  0x89   : > { %8374 = vmatmul.mubr.msk.f32.gmra.mrb[24].mxu1 %vm216_vm1, %v169_v58  ;;  %8798 = vmatmul.mubr.msk.f32.gmra.mrb[24].mxu0 %vm216_vm1, %v10150_v2  ;;  %v173_v58 = vld [vmem:[%s9705_s22 + $0xe8] sm:$0xff] }
  0x8a   : > { %8376 = vmatprep.mubr.msk.f32.mxu1 %vm216_vm1, %v170_v14  ;;  %8800 = vmatprep.mubr.msk.f32.mxu0 %vm216_vm1, %v10154_v18  ;;  %v10178_v14 = vld [vmem:[%s9705_s22 + $0x221] sm:$0xff]  ;;  %v174_v18 = vld [vmem:[%s9705_s22 + $0xf0] sm:$0xff] }
  0x8b   : > { %11398 = vst [vmem:[#allocation10_spill] sm:$0xff] %v10178_v14  ;;  %v10182_v2 = vld [vmem:[%s9705_s22 + $0x229] sm:$0xff] }
  0x8c   : > { %11399 = vst [vmem:[#allocation11_spill] sm:$0xff] %v10182_v2 }
  0x8d   : > { %8377 = vmatmul.mubr.msk.f32.gmra.mrb[26].mxu1 %vm216_vm1, %v171_v26  ;;  %8801 = vmatmul.mubr.msk.f32.gmra.mrb[26].mxu0 %vm216_vm1, %v10164_v42  ;;  %v10192_v26 = vld [vmem:[%s9705_s22 + $0x231] sm:$0xff]  ;;  %v7296_v42 = vld [vmem:[%s9705_s22 + $0x239] sm:$0xff] }
  0x8e   : > { %8379 = vmatprep.mubr.msk.f32.mxu1 %vm216_vm1, %v172_v50  ;;  %8803 = vmatprep.mubr.msk.f32.mxu0 %vm216_vm1, %v10168_v38  ;;  %v175_v50 = vld [vmem:[%s9705_s22 + $0xf8] sm:$0xff]  ;;  %11400 = vst [vmem:[#allocation12_spill] sm:$0xff] %v10192_v26  ;;  %v176_v38 = vld [vmem:[%s9705_s22 + $0x100] sm:$0xff] }
  0x91   : > { %8380 = vmatmul.mubr.msk.f32.gmra.mrb[28].mxu1 %vm216_vm1, %v173_v58  ;;  %8804 = vmatmul.mubr.msk.f32.gmra.mrb[28].mxu0 %vm216_vm1, %v10178_v14  ;;  %v7297_v58 = vld [vmem:[%s9705_s22 + $0x241] sm:$0xff]  ;;  %v4180_v14 = vld [vmem:[%s9705_s22 + $0x12] sm:$0xff] }
  0x92   : > { %8382 = vmatprep.mubr.msk.f32.mxu1 %vm216_vm1, %v174_v18  ;;  %8806 = vmatprep.mubr.msk.f32.mxu0 %vm216_vm1, %v10182_v2  ;;  %v177_v18 = vld [vmem:[%s9705_s22 + $0x108] sm:$0xff] }
  0x93   : > { %v898_v2 = vld [vmem:[%s9705_s22 + $0x1] sm:$0xff] }
  0x95   : > { %8383 = vmatmul.mubr.msk.f32.gmra.mrb[30].mxu1 %vm216_vm1, %v175_v50  ;;  %8807 = vmatmul.mubr.msk.f32.gmra.mrb[30].mxu0 %vm216_vm1, %v10192_v26  ;;  %v899_v50 = vld [vmem:[%s9705_s22 + $0x9] sm:$0xff]  ;;  %v4181_v26 = vld [vmem:[%s9705_s22 + $0x1a] sm:$0xff] }
  0x96   : > { %8385 = vmatprep.mubr.msk.f32.mxu1 %vm216_vm1, %v176_v38  ;;  %8809 = vmatprep.mubr.msk.f32.mxu0 %vm216_vm1, %v7296_v42  ;;  %v10217_v38 = vld [vmem:[%s11367_s1 + $0x10] sm:$0x7] }
  0x97   : > { %v4183_v42 = vld [vmem:[%s9705_s22 + $0x2a] sm:$0xff] }
  0x99   : > { %8386 = vmatmul.mubr.msk.f32.gmra.mrb[32].mxu1 %vm216_vm1, %v177_v18  ;;  %8810 = vmatmul.mubr.msk.f32.gmra.mrb[32].mxu0 %vm216_vm1, %v7297_v58  ;;  %v7373_v18 = vld [vmem:[%s9705_s22 + $0x152] sm:$0xff]  ;;  %v7374_v58 = vld [vmem:[%s9705_s22 + $0x15a] sm:$0xff] }
  0x9a   : > { %8390 = vmatprep.mubr.msk.f32.mxu1 %vm216_vm1, %v898_v2  ;;  %8814 = vmatprep.mubr.msk.f32.mxu0 %vm216_vm1, %v4180_v14  ;;  %v10222_v2 = vld [vmem:[%s11367_s1 + $0x30] sm:$0x7] }
  0x9b   : > { %v4184_v14 = vld [vmem:[%s9705_s22 + $0x32] sm:$0xff] }
  0x9d   : > { %8391 = vmatmul.mubr.msk.f32.vlgmr.msra.gmra.mrb[0].mxu1 %vm216_vm1, %v899_v50  ;;  %8815 = vmatmul.mubr.msk.f32.vlgmr.msra.gmra.mrb[0].mxu0 %vm216_vm1, %v4181_v26  ;;  %v7372_v26 = vld [vmem:[%s9705_s22 + $0x14a] sm:$0xff] }
  0x9e   : > { %8442 = vmatpush3.msk.msra.mxu1 %vm319_vm0, %v9976_v30  ;;  %8866 = vmatpush3.msk.msra.mxu0 %vm319_vm0, %v9981_v32  ;;  %v4186_v30 = vld [vmem:[%s9705_s22 + $0x42] sm:$0xff]  ;;  %v4188_v32 = vld [vmem:[%s9705_s22 + $0x52] sm:$0xff]  ;;  %v7376_v50 = vld [vmem:[%s9705_s22 + $0x16a] sm:$0xff] }
  0x9f   : > { %8393 = vmatprep.mubr.msk.f32.mxu1 %vm216_vm1, %v9709_v5  ;;  %8817 = vmatprep.mubr.msk.f32.mxu0 %vm216_vm1, %v4182_v8  ;;  %v4185_v5 = vld [vmem:[%s9705_s22 + $0x3a] sm:$0xff]  ;;  %v7371_v8 = vld [vmem:[%s9705_s22 + $0x142] sm:$0xff] }
  0xa0   : > { %8494 = vmatprep.subr.msk.mxu1 %vm319_vm0, %v10217_v38  ;;  %8918 = vmatprep.subr.msk.mxu0 %vm319_vm0, %v10222_v2 }
  0xa1   : > { %8394 = vmatmul.mubr.msk.f32.gmra.mrb[2].mxu1 %vm216_vm1, %v9716_v7  ;;  %8818 = vmatmul.mubr.msk.f32.gmra.mrb[2].mxu0 %vm216_vm1, %v4183_v42  ;;  %v4187_v7 = vld [vmem:[%s9705_s22 + $0x4a] sm:$0xff] }
  0xa2   : > { %8396 = vmatprep.mubr.msk.f32.mxu1 %vm216_vm1, %v9720_v9  ;;  %8820 = vmatprep.mubr.msk.f32.mxu0 %vm216_vm1, %v4184_v14  ;;  %v4189_v9 = vld [vmem:[%s9705_s22 + $0x5a] sm:$0xff]  ;;  %v7396_v42 = vld [vmem:[%s9705_s22 + $0x20a] sm:$0xff] }
  0xa3   : > { %v11403_v14 = vld [vmem:[#allocation4_spill] sm:$0xff] }
  0xa5   : > { %8397 = vmatmul.mubr.msk.f32.gmra.mrb[4].mxu1 %vm216_vm1, %v9739_v13  ;;  %8821 = vmatmul.mubr.msk.f32.gmra.mrb[4].mxu0 %vm216_vm1, %v4185_v5  ;;  %v4190_v13 = vld [vmem:[%s9705_s22 + $0x62] sm:$0xff]  ;;  %v7397_v5 = vld [vmem:[%s9705_s22 + $0x212] sm:$0xff] }
  0xa6   : > { %8399 = vmatprep.mubr.msk.f32.mxu1 %vm216_vm1, %v9746_v15  ;;  %8823 = vmatprep.mubr.msk.f32.mxu0 %vm216_vm1, %v4186_v30  ;;  %v4191_v15 = vld [vmem:[%s9705_s22 + $0x6a] sm:$0xff]  ;;  %v7398_v30 = vld [vmem:[%s9705_s22 + $0x21a] sm:$0xff] }
  0xa9   : > { %8400 = vmatmul.mubr.msk.f32.gmra.mrb[6].mxu1 %vm216_vm1, %v9760_v17  ;;  %8824 = vmatmul.mubr.msk.f32.gmra.mrb[6].mxu0 %vm216_vm1, %v4187_v7  ;;  %v4192_v17 = vld [vmem:[%s9705_s22 + $0x72] sm:$0xff]  ;;  %v11405_v7 = vld [vmem:[#allocation6_spill] sm:$0xff] }
  0xaa   : > { %8402 = vmatprep.mubr.msk.f32.mxu1 %vm216_vm1, %v9764_v19  ;;  %8826 = vmatprep.mubr.msk.f32.mxu0 %vm216_vm1, %v4188_v32  ;;  %v4193_v19 = vld [vmem:[%s9705_s22 + $0x7a] sm:$0xff]  ;;  %v11406_v32 = vld [vmem:[#allocation7_spill] sm:$0xff] }
  0xad   : > { %8403 = vmatmul.mubr.msk.f32.gmra.mrb[8].mxu1 %vm216_vm1, %v9774_v21  ;;  %8827 = vmatmul.mubr.msk.f32.gmra.mrb[8].mxu0 %vm216_vm1, %v4189_v9  ;;  %v4194_v21 = vld [vmem:[%s9705_s22 + $0x82] sm:$0xff] }
  0xae   : > { %8405 = vmatprep.mubr.msk.f32.mxu1 %vm216_vm1, %v9778_v23  ;;  %8829 = vmatprep.mubr.msk.f32.mxu0 %vm216_vm1, %v4190_v13  ;;  %v4195_v23 = vld [vmem:[%s9705_s22 + $0x8a] sm:$0xff]  ;;  %v7399_v9 = vld [vmem:[%s9705_s22 + $0x222] sm:$0xff] }
  0xaf   : > { %v7400_v13 = vld [vmem:[%s9705_s22 + $0x22a] sm:$0xff] }
  0xb1   : > { %8406 = vmatmul.mubr.msk.f32.gmra.mrb[10].mxu1 %vm216_vm1, %v9788_v25  ;;  %8830 = vmatmul.mubr.msk.f32.gmra.mrb[10].mxu0 %vm216_vm1, %v4191_v15  ;;  %v4196_v25 = vld [vmem:[%s9705_s22 + $0x92] sm:$0xff] }
  0xb2   : > { %8408 = vmatprep.mubr.msk.f32.mxu1 %vm216_vm1, %v9792_v27  ;;  %8832 = vmatprep.mubr.msk.f32.mxu0 %vm216_vm1, %v4192_v17  ;;  %v4197_v27 = vld [vmem:[%s9705_s22 + $0x9a] sm:$0xff]  ;;  %v11407_v15 = vld [vmem:[#allocation8_spill] sm:$0xff] }
  0xb3   : > { %v11408_v17 = vld [vmem:[#allocation9_spill] sm:$0xff] }
  0xb5   : > { %8409 = vmatmul.mubr.msk.f32.gmra.mrb[12].mxu1 %vm216_vm1, %v9802_v29  ;;  %8833 = vmatmul.mubr.msk.f32.gmra.mrb[12].mxu0 %vm216_vm1, %v4193_v19  ;;  %v4198_v29 = vld [vmem:[%s9705_s22 + $0xa2] sm:$0xff]  ;;  %v7401_v19 = vld [vmem:[%s9705_s22 + $0x232] sm:$0xff] }
  0xb6   : > { %8411 = vmatprep.mubr.msk.f32.mxu1 %vm216_vm1, %v9806_v31  ;;  %8835 = vmatprep.mubr.msk.f32.mxu0 %vm216_vm1, %v4194_v21  ;;  %v4199_v31 = vld [vmem:[%s9705_s22 + $0xaa] sm:$0xff]  ;;  %v7402_v21 = vld [vmem:[%s9705_s22 + $0x23a] sm:$0xff] }
  0xb9   : > { %8412 = vmatmul.mubr.msk.f32.gmra.mrb[14].mxu1 %vm216_vm1, %v9816_v33  ;;  %8836 = vmatmul.mubr.msk.f32.gmra.mrb[14].mxu0 %vm216_vm1, %v4195_v23  ;;  %v4200_v33 = vld [vmem:[%s9705_s22 + $0xb2] sm:$0xff]  ;;  %v11409_v23 = vld [vmem:[#allocation10_spill] sm:$0xff] }
  0xba   : > { %8414 = vmatprep.mubr.msk.f32.mxu1 %vm216_vm1, %v9820_v35  ;;  %8838 = vmatprep.mubr.msk.f32.mxu0 %vm216_vm1, %v4196_v25  ;;  %v4201_v35 = vld [vmem:[%s9705_s22 + $0xba] sm:$0xff]  ;;  %v11410_v25 = vld [vmem:[#allocation11_spill] sm:$0xff] }
  0xbd   : > { %8415 = vmatmul.mubr.msk.f32.gmra.mrb[16].mxu1 %vm216_vm1, %v9830_v37  ;;  %8839 = vmatmul.mubr.msk.f32.gmra.mrb[16].mxu0 %vm216_vm1, %v4197_v27  ;;  %v4202_v37 = vld [vmem:[%s9705_s22 + $0xc2] sm:$0xff] }
  0xbe   : > { %8417 = vmatprep.mubr.msk.f32.mxu1 %vm216_vm1, %v9834_v39  ;;  %8841 = vmatprep.mubr.msk.f32.mxu0 %vm216_vm1, %v4198_v29  ;;  %v4203_v39 = vld [vmem:[%s9705_s22 + $0xca] sm:$0xff]  ;;  %v7403_v27 = vld [vmem:[%s9705_s22 + $0x242] sm:$0xff] }
  0xbf   : > { %v6948_v29 = vld [vmem:[%s9705_s22 + $0x250] sm:$0xff] }
  0xc1   : > { %8418 = vmatmul.mubr.msk.f32.gmra.mrb[18].mxu1 %vm216_vm1, %v9844_v41  ;;  %8842 = vmatmul.mubr.msk.f32.gmra.mrb[18].mxu0 %vm216_vm1, %v4199_v31  ;;  %v4204_v41 = vld [vmem:[%s9705_s22 + $0xd2] sm:$0xff]  ;;  %v10512_v31 = vld [vmem:[%s9705_s22 + $0x261] sm:$0xff] }
  0xc2   : > { %8420 = vmatprep.mubr.msk.f32.mxu1 %vm216_vm1, %v9848_v43  ;;  %8844 = vmatprep.mubr.msk.f32.mxu0 %vm216_vm1, %v4200_v33  ;;  %v4205_v43 = vld [vmem:[%s9705_s22 + $0xda] sm:$0xff]  ;;  %v11411_v33 = vld [vmem:[#allocation12_spill] sm:$0xff] }
  0xc5   : > { %8421 = vmatmul.mubr.msk.f32.gmra.mrb[20].mxu1 %vm216_vm1, %v9858_v45  ;;  %8845 = vmatmul.mubr.msk.f32.gmra.mrb[20].mxu0 %vm216_vm1, %v4201_v35  ;;  %v4206_v45 = vld [vmem:[%s9705_s22 + $0xe2] sm:$0xff]  ;;  %v6949_v35 = vld [vmem:[%s9705_s22 + $0x258] sm:$0xff] }
  0xc6   : > { %8423 = vmatprep.mubr.msk.f32.mxu1 %vm216_vm1, %v9862_v47  ;;  %8847 = vmatprep.mubr.msk.f32.mxu0 %vm216_vm1, %v4202_v37  ;;  %v4207_v47 = vld [vmem:[%s9705_s22 + $0xea] sm:$0xff] }
  0xc7   : > { %v10522_v37 = vld [vmem:[%s9705_s22 + $0x269] sm:$0xff] }
  0xc9   : > { %8424 = vmatmul.mubr.msk.f32.gmra.mrb[22].mxu1 %vm216_vm1, %v9872_v49  ;;  %8848 = vmatmul.mubr.msk.f32.gmra.mrb[22].mxu0 %vm216_vm1, %v4203_v39  ;;  %v4208_v49 = vld [vmem:[%s9705_s22 + $0xf2] sm:$0xff]  ;;  %v6950_v39 = vld [vmem:[%s9705_s22 + $0x260] sm:$0xff] }
  0xca   : > { %8426 = vmatprep.mubr.msk.f32.mxu1 %vm216_vm1, %v9876_v51  ;;  %8850 = vmatprep.mubr.msk.f32.mxu0 %vm216_vm1, %v4204_v41  ;;  %v4209_v51 = vld [vmem:[%s9705_s22 + $0xfa] sm:$0xff]  ;;  %v10526_v41 = vld [vmem:[%s9705_s22 + $0x271] sm:$0xff] }
  0xcd   : > { %8427 = vmatmul.mubr.msk.f32.gmra.mrb[24].mxu1 %vm216_vm1, %v9886_v53  ;;  %8851 = vmatmul.mubr.msk.f32.gmra.mrb[24].mxu0 %vm216_vm1, %v4205_v43  ;;  %v4210_v53 = vld [vmem:[%s9705_s22 + $0x102] sm:$0xff]  ;;  %v10534_v43 = vld [vmem:[%s11367_s1 + $0x18] sm:$0x7] }
  0xce   : > { %8429 = vmatprep.mubr.msk.f32.mxu1 %vm216_vm1, %v9890_v55  ;;  %8853 = vmatprep.mubr.msk.f32.mxu0 %vm216_vm1, %v4206_v45  ;;  %v4211_v55 = vld [vmem:[%s9705_s22 + $0x10a] sm:$0xff]  ;;  %v10539_v45 = vld [vmem:[%s11367_s1 + $0x38] sm:$0x7] }
  0xd1   : > { %8430 = vmatmul.mubr.msk.f32.gmra.mrb[26].mxu1 %vm216_vm1, %v9900_v57  ;;  %8854 = vmatmul.mubr.msk.f32.gmra.mrb[26].mxu0 %vm216_vm1, %v4207_v47  ;;  %v4212_v57 = vld [vmem:[%s9705_s22 + $0x112] sm:$0xff]  ;;  %v6951_v47 = vld [vmem:[%s9705_s22 + $0x268] sm:$0xff] }
  0xd2   : > { %8432 = vmatprep.mubr.msk.f32.mxu1 %vm216_vm1, %v9904_v59  ;;  %8856 = vmatprep.mubr.msk.f32.mxu0 %vm216_vm1, %v4208_v49  ;;  %v4213_v59 = vld [vmem:[%s9705_s22 + $0x11a] sm:$0xff] }
  0xd3   : > { %v10547_v49 = vld [vmem:[%s9705_s22 + $0x279] sm:$0xff] }
  0xd5   : > { %8433 = vmatmul.mubr.msk.f32.gmra.mrb[28].mxu1 %vm216_vm1, %v9914_v61  ;;  %8857 = vmatmul.mubr.msk.f32.gmra.mrb[28].mxu0 %vm216_vm1, %v4209_v51  ;;  %v6878_v61 = vld [vmem:[%s9705_s22 + $0x129] sm:$0xff] }
  0xd6   : > { %8435 = vmatprep.mubr.msk.f32.mxu1 %vm216_vm1, %v9918_v63  ;;  %8859 = vmatprep.mubr.msk.f32.mxu0 %vm216_vm1, %v4210_v53  ;;  %v7370_v63 = vld [vmem:[%s9705_s22 + $0x13a] sm:$0xff]  ;;  %v6952_v51 = vld [vmem:[%s9705_s22 + $0x270] sm:$0xff] }
  0xd7   : > { %v10554_v53 = vld [vmem:[%s9705_s22 + $0x281] sm:$0xff] }
  0xd9   : > { %8436 = vmatmul.mubr.msk.f32.gmra.mrb[30].mxu1 %vm216_vm1, %v9928_v1  ;;  %8860 = vmatmul.mubr.msk.f32.gmra.mrb[30].mxu0 %vm216_vm1, %v4211_v55  ;;  %v6879_v1 = vld [vmem:[%s9705_s22 + $0x131] sm:$0xff] }
  0xda   : > { %8438 = vmatprep.mubr.msk.f32.mxu1 %vm216_vm1, %v9932_v3  ;;  %8862 = vmatprep.mubr.msk.f32.mxu0 %vm216_vm1, %v4212_v57  ;;  %v10371_v3 = vld [vmem:[%s11367_s1 + $0x14] sm:$0x7]  ;;  %v6953_v55 = vld [vmem:[%s9705_s22 + $0x278] sm:$0xff]  ;;  %v10568_v57 = vld [vmem:[%s9705_s22 + $0x289] sm:$0xff] }
  0xdd   : > { %8439 = vmatmul.mubr.msk.f32.gmra.mrb[32].mxu1 %vm216_vm1, %v9942_v6  ;;  %8863 = vmatmul.mubr.msk.f32.gmra.mrb[32].mxu0 %vm216_vm1, %v4213_v59  ;;  %v10376_v6 = vld [vmem:[%s11367_s1 + $0x34] sm:$0x7]  ;;  %v6954_v59 = vld [vmem:[%s9705_s22 + $0x280] sm:$0xff] }
  0xde   : > { %8443 = vmatprep.mubr.msk.f32.mxu1 %vm216_vm1, %v6878_v61  ;;  %8867 = vmatprep.mubr.msk.f32.mxu0 %vm216_vm1, %v7370_v63  ;;  %v10572_v61 = vld [vmem:[%s9705_s22 + $0x291] sm:$0xff]  ;;  %v6955_v63 = vld [vmem:[%s9705_s22 + $0x288] sm:$0xff] }
  0xe1   : > { %8444 = vmatmul.mubr.msk.f32.vlgmr.msra.gmra.mrb[0].mxu1 %vm216_vm1, %v6879_v1  ;;  %8868 = vmatmul.mubr.msk.f32.vlgmr.msra.gmra.mrb[0].mxu0 %vm216_vm1, %v7371_v8  ;;  %v10582_v1 = vld [vmem:[%s9705_s22 + $0x299] sm:$0xff]  ;;  %v6956_v8 = vld [vmem:[%s9705_s22 + $0x290] sm:$0xff] }
  0xe2   : > { %8495 = vmatpush3.msk.msra.mxu1 %vm319_vm0, %v10217_v38  ;;  %8919 = vmatpush3.msk.msra.mxu0 %vm319_vm0, %v10222_v2  ;;  %v7378_v38 = vld [vmem:[%s9705_s22 + $0x17a] sm:$0xff] }
  0xe3   : > { %8446 = vmatprep.mubr.msk.f32.mxu1 %vm216_vm1, %v9955_v20  ;;  %8870 = vmatprep.mubr.msk.f32.mxu0 %vm216_vm1, %v7372_v26  ;;  %v7375_v20 = vld [vmem:[%s9705_s22 + $0x162] sm:$0xff] }
  0xe4   : > { %8547 = vmatprep.subr.msk.mxu1 %vm319_vm0, %v10371_v3  ;;  %8971 = vmatprep.subr.msk.mxu0 %vm319_vm0, %v10376_v6  ;;  %v11401_v2 = vld [vmem:[#allocation2_spill] sm:$0xff] }
  0xe5   : > { %8447 = vmatmul.mubr.msk.f32.gmra.mrb[2].mxu1 %vm216_vm1, %v9964_v24  ;;  %8871 = vmatmul.mubr.msk.f32.gmra.mrb[2].mxu0 %vm216_vm1, %v7373_v18  ;;  %v7377_v24 = vld [vmem:[%s9705_s22 + $0x172] sm:$0xff]  ;;  %v10586_v26 = vld [vmem:[%s9705_s22 + $0x2a1] sm:$0xff] }
  0xe6   : > { %8449 = vmatprep.mubr.msk.f32.mxu1 %vm216_vm1, %v9968_v28  ;;  %8873 = vmatprep.mubr.msk.f32.mxu0 %vm216_vm1, %v7374_v58  ;;  %v7379_v28 = vld [vmem:[%s9705_s22 + $0x182] sm:$0xff]  ;;  %v10600_v58 = vld [vmem:[%s9705_s22 + $0x2b1] sm:$0xff] }
  0xe7   : > { %v6958_v18 = vld [vmem:[%s9705_s22 + $0x2a0] sm:$0xff] }
  0xe9   : > { %8450 = vmatmul.mubr.msk.f32.gmra.mrb[4].mxu1 %vm216_vm1, %v9989_v36  ;;  %8874 = vmatmul.mubr.msk.f32.gmra.mrb[4].mxu0 %vm216_vm1, %v7375_v20  ;;  %v7380_v36 = vld [vmem:[%s9705_s22 + $0x18a] sm:$0xff] }
  0xea   : > { %8452 = vmatprep.mubr.msk.f32.mxu1 %vm216_vm1, %v9996_v40  ;;  %8876 = vmatprep.mubr.msk.f32.mxu0 %vm216_vm1, %v7376_v50  ;;  %v7381_v40 = vld [vmem:[%s9705_s22 + $0x192] sm:$0xff]  ;;  %v6959_v20 = vld [vmem:[%s9705_s22 + $0x2a8] sm:$0xff] }
  0xeb   : > { %v10610_v50 = vld [vmem:[%s9705_s22 + $0x2b9] sm:$0xff] }
  0xed   : > { %8453 = vmatmul.mubr.msk.f32.gmra.mrb[6].mxu1 %vm216_vm1, %v10010_v11  ;;  %8877 = vmatmul.mubr.msk.f32.gmra.mrb[6].mxu0 %vm216_vm1, %v7377_v24  ;;  %v7382_v11 = vld [vmem:[%s9705_s22 + $0x19a] sm:$0xff]  ;;  %v6960_v24 = vld [vmem:[%s9705_s22 + $0x2b0] sm:$0xff] }
  0xee   : > { %8455 = vmatprep.mubr.msk.f32.mxu1 %vm216_vm1, %v10014_v44  ;;  %8879 = vmatprep.mubr.msk.f32.mxu0 %vm216_vm1, %v7378_v38  ;;  %v7383_v44 = vld [vmem:[%s9705_s22 + $0x1a2] sm:$0xff] }
  0xef   : > { %v10614_v38 = vld [vmem:[%s9705_s22 + $0x2c1] sm:$0xff] }
  0xf1   : > { %8456 = vmatmul.mubr.msk.f32.gmra.mrb[8].mxu1 %vm216_vm1, %v10024_v48  ;;  %8880 = vmatmul.mubr.msk.f32.gmra.mrb[8].mxu0 %vm216_vm1, %v7379_v28  ;;  %v7384_v48 = vld [vmem:[%s9705_s22 + $0x1aa] sm:$0xff]  ;;  %v6961_v28 = vld [vmem:[%s9705_s22 + $0x2b8] sm:$0xff] }
  0xf2   : > { %8458 = vmatprep.mubr.msk.f32.mxu1 %vm216_vm1, %v10028_v52  ;;  %8882 = vmatprep.mubr.msk.f32.mxu0 %vm216_vm1, %v7380_v36  ;;  %v7385_v52 = vld [vmem:[%s9705_s22 + $0x1b2] sm:$0xff]  ;;  %v10624_v36 = vld [vmem:[%s9705_s22 + $0x2c9] sm:$0xff] }
  0xf5   : > { %8459 = vmatmul.mubr.msk.f32.gmra.mrb[10].mxu1 %vm216_vm1, %v10038_v56  ;;  %8883 = vmatmul.mubr.msk.f32.gmra.mrb[10].mxu0 %vm216_vm1, %v7381_v40  ;;  %v7386_v56 = vld [vmem:[%s9705_s22 + $0x1ba] sm:$0xff] }
  0xf6   : > { %8461 = vmatprep.mubr.msk.f32.mxu1 %vm216_vm1, %v10042_v60  ;;  %8885 = vmatprep.mubr.msk.f32.mxu0 %vm216_vm1, %v7382_v11  ;;  %v7387_v60 = vld [vmem:[%s9705_s22 + $0x1c2] sm:$0xff]  ;;  %v10628_v11 = vld [vmem:[%s9705_s22 + $0x2d1] sm:$0xff] }
  0xf7   : > { %v6962_v40 = vld [vmem:[%s9705_s22 + $0x2c0] sm:$0xff] }
  0xf9   : > { %8462 = vmatmul.mubr.msk.f32.gmra.mrb[12].mxu1 %vm216_vm1, %v10052_v0  ;;  %8886 = vmatmul.mubr.msk.f32.gmra.mrb[12].mxu0 %vm216_vm1, %v7383_v44  ;;  %v7388_v0 = vld [vmem:[%s9705_s22 + $0x1ca] sm:$0xff] }
  0xfa   : > { %8464 = vmatprep.mubr.msk.f32.mxu1 %vm216_vm1, %v10056_v4  ;;  %8888 = vmatprep.mubr.msk.f32.mxu0 %vm216_vm1, %v7384_v48  ;;  %v7389_v4 = vld [vmem:[%s9705_s22 + $0x1d2] sm:$0xff]  ;;  %v6963_v44 = vld [vmem:[%s9705_s22 + $0x2c8] sm:$0xff] }
  0xfb   : > { %v10638_v48 = vld [vmem:[%s9705_s22 + $0x2d9] sm:$0xff] }
  0xfd   : > { %8465 = vmatmul.mubr.msk.f32.gmra.mrb[14].mxu1 %vm216_vm1, %v10066_v12  ;;  %8889 = vmatmul.mubr.msk.f32.gmra.mrb[14].mxu0 %vm216_vm1, %v7385_v52  ;;  %v7390_v12 = vld [vmem:[%s9705_s22 + $0x1da] sm:$0xff]  ;;  %v6964_v52 = vld [vmem:[%s9705_s22 + $0x2d0] sm:$0xff] }
  0xfe   : > { %8467 = vmatprep.mubr.msk.f32.mxu1 %vm216_vm1, %v10070_v16  ;;  %8891 = vmatprep.mubr.msk.f32.mxu0 %vm216_vm1, %v7386_v56  ;;  %v7391_v16 = vld [vmem:[%s9705_s22 + $0x1e2] sm:$0xff] }
  0xff   : > { %v10642_v56 = vld [vmem:[%s9705_s22 + $0x2e1] sm:$0xff] }
 0x101   : > { %8468 = vmatmul.mubr.msk.f32.gmra.mrb[16].mxu1 %vm216_vm1, %v10080_v22  ;;  %8892 = vmatmul.mubr.msk.f32.gmra.mrb[16].mxu0 %vm216_vm1, %v7387_v60  ;;  %v7392_v22 = vld [vmem:[%s9705_s22 + $0x1ea] sm:$0xff]  ;;  %v6965_v60 = vld [vmem:[%s9705_s22 + $0x2d8] sm:$0xff] }
 0x102   : > { %8470 = vmatprep.mubr.msk.f32.mxu1 %vm216_vm1, %v10084_v34  ;;  %8894 = vmatprep.mubr.msk.f32.mxu0 %vm216_vm1, %v7388_v0  ;;  %v7393_v34 = vld [vmem:[%s9705_s22 + $0x1f2] sm:$0xff]  ;;  %v10652_v0 = vld [vmem:[%s9705_s22 + $0x2e9] sm:$0xff] }
 0x105   : > { %8471 = vmatmul.mubr.msk.f32.gmra.mrb[18].mxu1 %vm216_vm1, %v10094_v10  ;;  %8895 = vmatmul.mubr.msk.f32.gmra.mrb[18].mxu0 %vm216_vm1, %v7389_v4  ;;  %v7394_v10 = vld [vmem:[%s9705_s22 + $0x1fa] sm:$0xff] }
 0x106   : > { %8473 = vmatprep.mubr.msk.f32.mxu1 %vm216_vm1, %v10098_v46  ;;  %8897 = vmatprep.mubr.msk.f32.mxu0 %vm216_vm1, %v7390_v12  ;;  %v11402_v46 = vld [vmem:[#allocation3_spill] sm:$0xff]  ;;  %v6966_v4 = vld [vmem:[%s9705_s22 + $0x2e0] sm:$0xff]  ;;  %v10656_v12 = vld [vmem:[%s9705_s22 + $0x2f1] sm:$0xff] }
 0x109   : > { %8474 = vmatmul.mubr.msk.f32.gmra.mrb[20].mxu1 %vm216_vm1, %v10108_v54  ;;  %8898 = vmatmul.mubr.msk.f32.gmra.mrb[20].mxu0 %vm216_vm1, %v7391_v16  ;;  %v7395_v54 = vld [vmem:[%s9705_s22 + $0x202] sm:$0xff] }
 0x10a   : > { %8476 = vmatprep.mubr.msk.f32.mxu1 %vm216_vm1, %v10112_v62  ;;  %8900 = vmatprep.mubr.msk.f32.mxu0 %vm216_vm1, %v7392_v22  ;;  %v11404_v62 = vld [vmem:[#allocation5_spill] sm:$0xff]  ;;  %v6967_v16 = vld [vmem:[%s9705_s22 + $0x2e8] sm:$0xff] }
 0x10b   : > { %v10666_v22 = vld [vmem:[%s9705_s22 + $0x2f9] sm:$0xff] }
 0x10d   : > { %8477 = vmatmul.mubr.msk.f32.gmra.mrb[22].mxu1 %vm216_vm1, %v11401_v2  ;;  %8901 = vmatmul.mubr.msk.f32.gmra.mrb[22].mxu0 %vm216_vm1, %v7393_v34  ;;  %v6968_v34 = vld [vmem:[%s9705_s22 + $0x2f0] sm:$0xff]  ;;  %v6969_v2 = vld [vmem:[%s9705_s22 + $0x2f8] sm:$0xff] }
 0x10e   : > { %8479 = vmatprep.mubr.msk.f32.mxu1 %vm216_vm1, %v11402_v46  ;;  %8903 = vmatprep.mubr.msk.f32.mxu0 %vm216_vm1, %v7394_v10  ;;  %v10670_v10 = vld [vmem:[%s9705_s22 + $0x301] sm:$0xff]  ;;  %v10680_v46 = vld [vmem:[%s9705_s22 + $0x309] sm:$0xff] }
 0x111   : > { %8480 = vmatmul.mubr.msk.f32.gmra.mrb[24].mxu1 %vm216_vm1, %v11403_v14  ;;  %8904 = vmatmul.mubr.msk.f32.gmra.mrb[24].mxu0 %vm216_vm1, %v7395_v54  ;;  %v6970_v54 = vld [vmem:[%s9705_s22 + $0x300] sm:$0xff]  ;;  %v6971_v14 = vld [vmem:[%s9705_s22 + $0x308] sm:$0xff] }
 0x112   : > { %8482 = vmatprep.mubr.msk.f32.mxu1 %vm216_vm1, %v11404_v62  ;;  %8906 = vmatprep.mubr.msk.f32.mxu0 %vm216_vm1, %v7396_v42  ;;  %v10684_v42 = vld [vmem:[%s9705_s22 + $0x311] sm:$0xff]  ;;  %v10694_v62 = vld [vmem:[%s9705_s22 + $0x319] sm:$0xff] }
 0x115   : > { %8483 = vmatmul.mubr.msk.f32.gmra.mrb[26].mxu1 %vm216_vm1, %v11405_v7  ;;  %8907 = vmatmul.mubr.msk.f32.gmra.mrb[26].mxu0 %vm216_vm1, %v7397_v5  ;;  %v6972_v5 = vld [vmem:[%s9705_s22 + $0x310] sm:$0xff]  ;;  %v6973_v7 = vld [vmem:[%s9705_s22 + $0x318] sm:$0xff] }
 0x116   : > { %8485 = vmatprep.mubr.msk.f32.mxu1 %vm216_vm1, %v11406_v32  ;;  %8909 = vmatprep.mubr.msk.f32.mxu0 %vm216_vm1, %v7398_v30  ;;  %v10698_v30 = vld [vmem:[%s9705_s22 + $0x321] sm:$0xff]  ;;  %v10708_v32 = vld [vmem:[%s9705_s22 + $0x329] sm:$0xff] }
 0x119   : > { %8486 = vmatmul.mubr.msk.f32.gmra.mrb[28].mxu1 %vm216_vm1, %v11407_v15  ;;  %8910 = vmatmul.mubr.msk.f32.gmra.mrb[28].mxu0 %vm216_vm1, %v7399_v9  ;;  %v6974_v9 = vld [vmem:[%s9705_s22 + $0x320] sm:$0xff]  ;;  %v6975_v15 = vld [vmem:[%s9705_s22 + $0x328] sm:$0xff] }
 0x11a   : > { %8488 = vmatprep.mubr.msk.f32.mxu1 %vm216_vm1, %v11408_v17  ;;  %8912 = vmatprep.mubr.msk.f32.mxu0 %vm216_vm1, %v7400_v13  ;;  %v10712_v13 = vld [vmem:[%s9705_s22 + $0x331] sm:$0xff]  ;;  %v10722_v17 = vld [vmem:[%s9705_s22 + $0x339] sm:$0xff] }
 0x11d   : > { %8489 = vmatmul.mubr.msk.f32.gmra.mrb[30].mxu1 %vm216_vm1, %v11409_v23  ;;  %8913 = vmatmul.mubr.msk.f32.gmra.mrb[30].mxu0 %vm216_vm1, %v7401_v19  ;;  %v6976_v19 = vld [vmem:[%s9705_s22 + $0x330] sm:$0xff]  ;;  %v6977_v23 = vld [vmem:[%s9705_s22 + $0x338] sm:$0xff] }
 0x11e   : > { %8491 = vmatprep.mubr.msk.f32.mxu1 %vm216_vm1, %v11410_v25  ;;  %8915 = vmatprep.mubr.msk.f32.mxu0 %vm216_vm1, %v7402_v21  ;;  %v10726_v21 = vld [vmem:[%s9705_s22 + $0x341] sm:$0xff]  ;;  %v10736_v25 = vld [vmem:[%s9705_s22 + $0x349] sm:$0xff] }
 0x121   : > { %8492 = vmatmul.mubr.msk.f32.gmra.mrb[32].mxu1 %vm216_vm1, %v11411_v33  ;;  %8916 = vmatmul.mubr.msk.f32.gmra.mrb[32].mxu0 %vm216_vm1, %v7403_v27  ;;  %v6978_v27 = vld [vmem:[%s9705_s22 + $0x340] sm:$0xff]  ;;  %v6979_v33 = vld [vmem:[%s9705_s22 + $0x348] sm:$0xff] }
 0x122   : > { %8496 = vmatprep.mubr.msk.f32.mxu1 %vm216_vm1, %v6948_v29  ;;  %8920 = vmatprep.mubr.msk.f32.mxu0 %vm216_vm1, %v10512_v31  ;;  %v10740_v29 = vld [vmem:[%s9705_s22 + $0x351] sm:$0xff] }
 0x125   : > { %8497 = vmatmul.mubr.msk.f32.vlgmr.msra.gmra.mrb[0].mxu1 %vm216_vm1, %v6949_v35  ;;  %8921 = vmatmul.mubr.msk.f32.vlgmr.msra.gmra.mrb[0].mxu0 %vm216_vm1, %v10522_v37  ;;  %v10750_v35 = vld [vmem:[%s9705_s22 + $0x359] sm:$0xff] }
 0x126   : > { %8548 = vmatpush3.msk.msra.mxu1 %vm319_vm0, %v10371_v3  ;;  %8972 = vmatpush3.msk.msra.mxu0 %vm319_vm0, %v10376_v6  ;;  %v6957_v3 = vld [vmem:[%s9705_s22 + $0x298] sm:$0xff]  ;;  %v10596_v6 = vld [vmem:[%s9705_s22 + $0x2a9] sm:$0xff] }
 0x127   : > { %8499 = vmatprep.mubr.msk.f32.mxu1 %vm216_vm1, %v6950_v39  ;;  %8923 = vmatprep.mubr.msk.f32.mxu0 %vm216_vm1, %v10526_v41  ;;  %v6980_v39 = vld [vmem:[%s9705_s22 + $0x350] sm:$0xff] }
 0x128   : > { %8600 = vmatprep.subr.msk.mxu1 %vm319_vm0, %v10534_v43  ;;  %9024 = vmatprep.subr.msk.mxu0 %vm319_vm0, %v10539_v45 }
 0x129   : > { %8500 = vmatmul.mubr.msk.f32.gmra.mrb[2].mxu1 %vm216_vm1, %v6951_v47  ;;  %8924 = vmatmul.mubr.msk.f32.gmra.mrb[2].mxu0 %vm216_vm1, %v10547_v49  ;;  %v7472_v47 = vld [vmem:[%s9705_s22 + $0x361] sm:$0xff] }
 0x12a   : > { %8502 = vmatprep.mubr.msk.f32.mxu1 %vm216_vm1, %v6952_v51  ;;  %8926 = vmatprep.mubr.msk.f32.mxu0 %vm216_vm1, %v10554_v53  ;;  %v6981_v51 = vld [vmem:[%s9705_s22 + $0x358] sm:$0xff] }
 0x12d   : > { %8503 = vmatmul.mubr.msk.f32.gmra.mrb[4].mxu1 %vm216_vm1, %v6953_v55  ;;  %8927 = vmatmul.mubr.msk.f32.gmra.mrb[4].mxu0 %vm216_vm1, %v10568_v57  ;;  %v7473_v55 = vld [vmem:[%s9705_s22 + $0x369] sm:$0xff] }
 0x12e   : > { %8505 = vmatprep.mubr.msk.f32.mxu1 %vm216_vm1, %v6954_v59  ;;  %8929 = vmatprep.mubr.msk.f32.mxu0 %vm216_vm1, %v10572_v61  ;;  %v7018_v59 = vld [vmem:[%s9705_s22 + $0x378] sm:$0xff] }
 0x131   : > { %8506 = vmatmul.mubr.msk.f32.gmra.mrb[6].mxu1 %vm216_vm1, %v6955_v63  ;;  %8930 = vmatmul.mubr.msk.f32.gmra.mrb[6].mxu0 %vm216_vm1, %v10582_v1  ;;  %v10763_v63 = vld [vmem:[%s9705_s22 + $0x389] sm:$0xff] }
 0x132   : > { %8508 = vmatprep.mubr.msk.f32.mxu1 %vm216_vm1, %v6956_v8  ;;  %8932 = vmatprep.mubr.msk.f32.mxu0 %vm216_vm1, %v10586_v26  ;;  %v7019_v8 = vld [vmem:[%s9705_s22 + $0x380] sm:$0xff] }
 0x135   : > { %8509 = vmatmul.mubr.msk.f32.gmra.mrb[8].mxu1 %vm216_vm1, %v6957_v3  ;;  %8933 = vmatmul.mubr.msk.f32.gmra.mrb[8].mxu0 %vm216_vm1, %v10596_v6  ;;  %v10772_v3 = vld [vmem:[%s9705_s22 + $0x391] sm:$0xff] }
 0x136   : > { %8511 = vmatprep.mubr.msk.f32.mxu1 %vm216_vm1, %v6958_v18  ;;  %8935 = vmatprep.mubr.msk.f32.mxu0 %vm216_vm1, %v10600_v58  ;;  %v7020_v18 = vld [vmem:[%s9705_s22 + $0x388] sm:$0xff] }
 0x139   : > { %8512 = vmatmul.mubr.msk.f32.gmra.mrb[10].mxu1 %vm216_vm1, %v6959_v20  ;;  %8936 = vmatmul.mubr.msk.f32.gmra.mrb[10].mxu0 %vm216_vm1, %v10610_v50  ;;  %v10776_v20 = vld [vmem:[%s9705_s22 + $0x399] sm:$0xff] }
 0x13a   : > { %8514 = vmatprep.mubr.msk.f32.mxu1 %vm216_vm1, %v6960_v24  ;;  %8938 = vmatprep.mubr.msk.f32.mxu0 %vm216_vm1, %v10614_v38  ;;  %v10784_v24 = vld [vmem:[%s11367_s1 + $0x1c] sm:$0x7] }
 0x13d   : > { %8515 = vmatmul.mubr.msk.f32.gmra.mrb[12].mxu1 %vm216_vm1, %v6961_v28  ;;  %8939 = vmatmul.mubr.msk.f32.gmra.mrb[12].mxu0 %vm216_vm1, %v10624_v36  ;;  %v10789_v28 = vld [vmem:[%s11367_s1 + $0x3c] sm:$0x7] }
 0x13e   : > { %8517 = vmatprep.mubr.msk.f32.mxu1 %vm216_vm1, %v6962_v40  ;;  %8941 = vmatprep.mubr.msk.f32.mxu0 %vm216_vm1, %v10628_v11  ;;  %v7021_v40 = vld [vmem:[%s9705_s22 + $0x390] sm:$0xff] }
 0x141   : > { %8518 = vmatmul.mubr.msk.f32.gmra.mrb[14].mxu1 %vm216_vm1, %v6963_v44  ;;  %8942 = vmatmul.mubr.msk.f32.gmra.mrb[14].mxu0 %vm216_vm1, %v10638_v48  ;;  %v10797_v44 = vld [vmem:[%s9705_s22 + $0x3a1] sm:$0xff] }
 0x142   : > { %8520 = vmatprep.mubr.msk.f32.mxu1 %vm216_vm1, %v6964_v52  ;;  %8944 = vmatprep.mubr.msk.f32.mxu0 %vm216_vm1, %v10642_v56  ;;  %v7022_v52 = vld [vmem:[%s9705_s22 + $0x398] sm:$0xff] }
 0x145   : > { %8521 = vmatmul.mubr.msk.f32.gmra.mrb[16].mxu1 %vm216_vm1, %v6965_v60  ;;  %8945 = vmatmul.mubr.msk.f32.gmra.mrb[16].mxu0 %vm216_vm1, %v10652_v0  ;;  %v10804_v60 = vld [vmem:[%s9705_s22 + $0x3a9] sm:$0xff] }
 0x146   : > { %8523 = vmatprep.mubr.msk.f32.mxu1 %vm216_vm1, %v6966_v4  ;;  %8947 = vmatprep.mubr.msk.f32.mxu0 %vm216_vm1, %v10656_v12  ;;  %v7024_v4 = vld [vmem:[%s9705_s22 + $0x3a8] sm:$0xff] }
 0x149   : > { %8524 = vmatmul.mubr.msk.f32.gmra.mrb[18].mxu1 %vm216_vm1, %v6967_v16  ;;  %8948 = vmatmul.mubr.msk.f32.gmra.mrb[18].mxu0 %vm216_vm1, %v10666_v22  ;;  %v10822_v16 = vld [vmem:[%s9705_s22 + $0x3b9] sm:$0xff] }
 0x14a   : > { %8526 = vmatprep.mubr.msk.f32.mxu1 %vm216_vm1, %v6968_v34  ;;  %8950 = vmatprep.mubr.msk.f32.mxu0 %vm216_vm1, %v10670_v10  ;;  %v7025_v34 = vld [vmem:[%s9705_s22 + $0x3b0] sm:$0xff] }
 0x14d   : > { %8527 = vmatmul.mubr.msk.f32.gmra.mrb[20].mxu1 %vm216_vm1, %v6969_v2  ;;  %8951 = vmatmul.mubr.msk.f32.gmra.mrb[20].mxu0 %vm216_vm1, %v10680_v46  ;;  %v10832_v2 = vld [vmem:[%s9705_s22 + $0x3c1] sm:$0xff] }
 0x14e   : > { %8529 = vmatprep.mubr.msk.f32.mxu1 %vm216_vm1, %v6970_v54  ;;  %8953 = vmatprep.mubr.msk.f32.mxu0 %vm216_vm1, %v10684_v42  ;;  %v7026_v54 = vld [vmem:[%s9705_s22 + $0x3b8] sm:$0xff] }
 0x151   : > { %8530 = vmatmul.mubr.msk.f32.gmra.mrb[22].mxu1 %vm216_vm1, %v6971_v14  ;;  %8954 = vmatmul.mubr.msk.f32.gmra.mrb[22].mxu0 %vm216_vm1, %v10694_v62  ;;  %v10836_v14 = vld [vmem:[%s9705_s22 + $0x3c9] sm:$0xff] }
 0x152   : > { %8532 = vmatprep.mubr.msk.f32.mxu1 %vm216_vm1, %v6972_v5  ;;  %8956 = vmatprep.mubr.msk.f32.mxu0 %vm216_vm1, %v10698_v30  ;;  %v7027_v5 = vld [vmem:[%s9705_s22 + $0x3c0] sm:$0xff] }
 0x155   : > { %8533 = vmatmul.mubr.msk.f32.gmra.mrb[24].mxu1 %vm216_vm1, %v6973_v7  ;;  %8957 = vmatmul.mubr.msk.f32.gmra.mrb[24].mxu0 %vm216_vm1, %v10708_v32  ;;  %v10846_v7 = vld [vmem:[%s9705_s22 + $0x3d1] sm:$0xff] }
 0x156   : > { %8535 = vmatprep.mubr.msk.f32.mxu1 %vm216_vm1, %v6974_v9  ;;  %8959 = vmatprep.mubr.msk.f32.mxu0 %vm216_vm1, %v10712_v13  ;;  %v7028_v9 = vld [vmem:[%s9705_s22 + $0x3c8] sm:$0xff] }
 0x159   : > { %8536 = vmatmul.mubr.msk.f32.gmra.mrb[26].mxu1 %vm216_vm1, %v6975_v15  ;;  %8960 = vmatmul.mubr.msk.f32.gmra.mrb[26].mxu0 %vm216_vm1, %v10722_v17  ;;  %v10850_v15 = vld [vmem:[%s9705_s22 + $0x3d9] sm:$0xff] }
 0x15a   : > { %8538 = vmatprep.mubr.msk.f32.mxu1 %vm216_vm1, %v6976_v19  ;;  %8962 = vmatprep.mubr.msk.f32.mxu0 %vm216_vm1, %v10726_v21  ;;  %v7029_v19 = vld [vmem:[%s9705_s22 + $0x3d0] sm:$0xff] }
 0x15d   : > { %8539 = vmatmul.mubr.msk.f32.gmra.mrb[28].mxu1 %vm216_vm1, %v6977_v23  ;;  %8963 = vmatmul.mubr.msk.f32.gmra.mrb[28].mxu0 %vm216_vm1, %v10736_v25  ;;  %v10860_v23 = vld [vmem:[%s9705_s22 + $0x3e1] sm:$0xff] }
 0x15e   : > { %8541 = vmatprep.mubr.msk.f32.mxu1 %vm216_vm1, %v6978_v27  ;;  %8965 = vmatprep.mubr.msk.f32.mxu0 %vm216_vm1, %v10740_v29  ;;  %v7030_v27 = vld [vmem:[%s9705_s22 + $0x3d8] sm:$0xff] }
 0x161   : > { %8542 = vmatmul.mubr.msk.f32.gmra.mrb[30].mxu1 %vm216_vm1, %v6979_v33  ;;  %8966 = vmatmul.mubr.msk.f32.gmra.mrb[30].mxu0 %vm216_vm1, %v10750_v35  ;;  %v10864_v33 = vld [vmem:[%s9705_s22 + $0x3e9] sm:$0xff] }
 0x162   : > { %8544 = vmatprep.mubr.msk.f32.mxu1 %vm216_vm1, %v6980_v39  ;;  %8968 = vmatprep.mubr.msk.f32.mxu0 %vm216_vm1, %v7472_v47  ;;  %v7031_v39 = vld [vmem:[%s9705_s22 + $0x3e0] sm:$0xff]  ;;  %v10874_v47 = vld [vmem:[%s9705_s22 + $0x3f1] sm:$0xff] }
 0x165   : > { %8545 = vmatmul.mubr.msk.f32.gmra.mrb[32].mxu1 %vm216_vm1, %v6981_v51  ;;  %8969 = vmatmul.mubr.msk.f32.gmra.mrb[32].mxu0 %vm216_vm1, %v7473_v55  ;;  %v7032_v51 = vld [vmem:[%s9705_s22 + $0x3e8] sm:$0xff]  ;;  %v10878_v55 = vld [vmem:[%s9705_s22 + $0x3f9] sm:$0xff] }
 0x166   : > { %8549 = vmatprep.mubr.msk.f32.mxu1 %vm216_vm1, %v7018_v59  ;;  %8973 = vmatprep.mubr.msk.f32.mxu0 %vm216_vm1, %v10763_v63  ;;  %v7033_v59 = vld [vmem:[%s9705_s22 + $0x3f0] sm:$0xff] }
 0x169   : > { %8550 = vmatmul.mubr.msk.f32.vlgmr.msra.gmra.mrb[0].mxu1 %vm216_vm1, %v7019_v8  ;;  %8974 = vmatmul.mubr.msk.f32.vlgmr.msra.gmra.mrb[0].mxu0 %vm216_vm1, %v10772_v3  ;;  %v10888_v8 = vld [vmem:[%s9705_s22 + $0x401] sm:$0xff] }
 0x16a   : > { %8601 = vmatpush3.msk.msra.mxu1 %vm319_vm0, %v10534_v43  ;;  %9025 = vmatpush3.msk.msra.mxu0 %vm319_vm0, %v10539_v45  ;;  %v7023_v43 = vld [vmem:[%s9705_s22 + $0x3a0] sm:$0xff]  ;;  %v10818_v45 = vld [vmem:[%s9705_s22 + $0x3b1] sm:$0xff] }
 0x16b   : > { %8552 = vmatprep.mubr.msk.f32.mxu1 %vm216_vm1, %v7020_v18  ;;  %8976 = vmatprep.mubr.msk.f32.mxu0 %vm216_vm1, %v10776_v20  ;;  %v7034_v18 = vld [vmem:[%s9705_s22 + $0x3f8] sm:$0xff] }
 0x16c   : > { %8653 = vmatprep.subr.msk.mxu1 %vm319_vm0, %v10784_v24  ;;  %9077 = vmatprep.subr.msk.mxu0 %vm319_vm0, %v10789_v28 }
 0x16d   : > { %8553 = vmatmul.mubr.msk.f32.gmra.mrb[2].mxu1 %vm216_vm1, %v7021_v40  ;;  %8977 = vmatmul.mubr.msk.f32.gmra.mrb[2].mxu0 %vm216_vm1, %v10797_v44  ;;  %v10892_v40 = vld [vmem:[%s9705_s22 + $0x409] sm:$0xff] }
 0x16e   : > { %8555 = vmatprep.mubr.msk.f32.mxu1 %vm216_vm1, %v7022_v52  ;;  %8979 = vmatprep.mubr.msk.f32.mxu0 %vm216_vm1, %v10804_v60  ;;  %v7035_v52 = vld [vmem:[%s9705_s22 + $0x400] sm:$0xff] }
 0x171   : > { %8556 = vmatmul.mubr.msk.f32.gmra.mrb[4].mxu1 %vm216_vm1, %v7023_v43  ;;  %8980 = vmatmul.mubr.msk.f32.gmra.mrb[4].mxu0 %vm216_vm1, %v10818_v45  ;;  %v10902_v43 = vld [vmem:[%s9705_s22 + $0x411] sm:$0xff] }
 0x172   : > { %8558 = vmatprep.mubr.msk.f32.mxu1 %vm216_vm1, %v7024_v4  ;;  %8982 = vmatprep.mubr.msk.f32.mxu0 %vm216_vm1, %v10822_v16  ;;  %v7036_v4 = vld [vmem:[%s9705_s22 + $0x408] sm:$0xff] }
 0x175   : > { %8559 = vmatmul.mubr.msk.f32.gmra.mrb[6].mxu1 %vm216_vm1, %v7025_v34  ;;  %8983 = vmatmul.mubr.msk.f32.gmra.mrb[6].mxu0 %vm216_vm1, %v10832_v2  ;;  %v10906_v34 = vld [vmem:[%s9705_s22 + $0x419] sm:$0xff] }
 0x176   : > { %8561 = vmatprep.mubr.msk.f32.mxu1 %vm216_vm1, %v7026_v54  ;;  %8985 = vmatprep.mubr.msk.f32.mxu0 %vm216_vm1, %v10836_v14  ;;  %v7037_v54 = vld [vmem:[%s9705_s22 + $0x410] sm:$0xff] }
 0x179   : > { %8562 = vmatmul.mubr.msk.f32.gmra.mrb[8].mxu1 %vm216_vm1, %v7027_v5  ;;  %8986 = vmatmul.mubr.msk.f32.gmra.mrb[8].mxu0 %vm216_vm1, %v10846_v7  ;;  %v10916_v5 = vld [vmem:[%s9705_s22 + $0x421] sm:$0xff] }
 0x17a   : > { %8564 = vmatprep.mubr.msk.f32.mxu1 %vm216_vm1, %v7028_v9  ;;  %8988 = vmatprep.mubr.msk.f32.mxu0 %vm216_vm1, %v10850_v15  ;;  %v7038_v9 = vld [vmem:[%s9705_s22 + $0x418] sm:$0xff] }
 0x17d   : > { %8565 = vmatmul.mubr.msk.f32.gmra.mrb[10].mxu1 %vm216_vm1, %v7029_v19  ;;  %8989 = vmatmul.mubr.msk.f32.gmra.mrb[10].mxu0 %vm216_vm1, %v10860_v23  ;;  %v10920_v19 = vld [vmem:[%s9705_s22 + $0x429] sm:$0xff] }
 0x17e   : > { %8567 = vmatprep.mubr.msk.f32.mxu1 %vm216_vm1, %v7030_v27  ;;  %8991 = vmatprep.mubr.msk.f32.mxu0 %vm216_vm1, %v10864_v33  ;;  %v7039_v27 = vld [vmem:[%s9705_s22 + $0x420] sm:$0xff] }
 0x181   : > { %8568 = vmatmul.mubr.msk.f32.gmra.mrb[12].mxu1 %vm216_vm1, %v7031_v39  ;;  %8992 = vmatmul.mubr.msk.f32.gmra.mrb[12].mxu0 %vm216_vm1, %v10874_v47  ;;  %v10930_v39 = vld [vmem:[%s9705_s22 + $0x431] sm:$0xff] }
 0x182   : > { %8570 = vmatprep.mubr.msk.f32.mxu1 %vm216_vm1, %v7032_v51  ;;  %8994 = vmatprep.mubr.msk.f32.mxu0 %vm216_vm1, %v10878_v55  ;;  %v7040_v51 = vld [vmem:[%s9705_s22 + $0x428] sm:$0xff] }
 0x185   : > { %8571 = vmatmul.mubr.msk.f32.gmra.mrb[14].mxu1 %vm216_vm1, %v7033_v59  ;;  %8995 = vmatmul.mubr.msk.f32.gmra.mrb[14].mxu0 %vm216_vm1, %v10888_v8  ;;  %v10934_v59 = vld [vmem:[%s9705_s22 + $0x439] sm:$0xff] }
 0x186   : > { %8573 = vmatprep.mubr.msk.f32.mxu1 %vm216_vm1, %v7034_v18  ;;  %8997 = vmatprep.mubr.msk.f32.mxu0 %vm216_vm1, %v10892_v40  ;;  %11412 = vst [vmem:[#allocation2_spill] sm:$0xff] %v10934_v59  ;;  %v7041_v18 = vld [vmem:[%s9705_s22 + $0x430] sm:$0xff] }
 0x189   : > { %8574 = vmatmul.mubr.msk.f32.gmra.mrb[16].mxu1 %vm216_vm1, %v7035_v52  ;;  %8998 = vmatmul.mubr.msk.f32.gmra.mrb[16].mxu0 %vm216_vm1, %v10902_v43  ;;  %v10944_v52 = vld [vmem:[%s9705_s22 + $0x441] sm:$0xff] }
 0x18a   : > { %8576 = vmatprep.mubr.msk.f32.mxu1 %vm216_vm1, %v7036_v4  ;;  %9000 = vmatprep.mubr.msk.f32.mxu0 %vm216_vm1, %v10906_v34  ;;  %11413 = vst [vmem:[#allocation3_spill] sm:$0xff] %v10944_v52  ;;  %v7042_v4 = vld [vmem:[%s9705_s22 + $0x438] sm:$0xff] }
 0x18d   : > { %8577 = vmatmul.mubr.msk.f32.gmra.mrb[18].mxu1 %vm216_vm1, %v7037_v54  ;;  %9001 = vmatmul.mubr.msk.f32.gmra.mrb[18].mxu0 %vm216_vm1, %v10916_v5  ;;  %v10948_v54 = vld [vmem:[%s9705_s22 + $0x449] sm:$0xff] }
 0x18e   : > { %8579 = vmatprep.mubr.msk.f32.mxu1 %vm216_vm1, %v7038_v9  ;;  %9003 = vmatprep.mubr.msk.f32.mxu0 %vm216_vm1, %v10920_v19  ;;  %11414 = vst [vmem:[#allocation4_spill] sm:$0xff] %v10948_v54  ;;  %v7043_v9 = vld [vmem:[%s9705_s22 + $0x440] sm:$0xff] }
 0x191   : > { %8580 = vmatmul.mubr.msk.f32.gmra.mrb[20].mxu1 %vm216_vm1, %v7039_v27  ;;  %9004 = vmatmul.mubr.msk.f32.gmra.mrb[20].mxu0 %vm216_vm1, %v10930_v39  ;;  %v10958_v27 = vld [vmem:[%s9705_s22 + $0x451] sm:$0xff] }
 0x192   : > { %8582 = vmatprep.mubr.msk.f32.mxu1 %vm216_vm1, %v7040_v51  ;;  %9006 = vmatprep.mubr.msk.f32.mxu0 %vm216_vm1, %v10934_v59  ;;  %11415 = vst [vmem:[#allocation5_spill] sm:$0xff] %v10958_v27  ;;  %v7044_v51 = vld [vmem:[%s9705_s22 + $0x448] sm:$0xff]  ;;  %v10962_v59 = vld [vmem:[%s9705_s22 + $0x459] sm:$0xff] }
 0x193   : > { %11416 = vst [vmem:[#allocation6_spill] sm:$0xff] %v10962_v59 }
 0x195   : > { %8583 = vmatmul.mubr.msk.f32.gmra.mrb[22].mxu1 %vm216_vm1, %v7041_v18  ;;  %9007 = vmatmul.mubr.msk.f32.gmra.mrb[22].mxu0 %vm216_vm1, %v10944_v52  ;;  %v7045_v18 = vld [vmem:[%s9705_s22 + $0x450] sm:$0xff] }
 0x196   : > { %8585 = vmatprep.mubr.msk.f32.mxu1 %vm216_vm1, %v7042_v4  ;;  %9009 = vmatprep.mubr.msk.f32.mxu0 %vm216_vm1, %v10948_v54  ;;  %v10972_v4 = vld [vmem:[%s9705_s22 + $0x461] sm:$0xff]  ;;  %v7046_v54 = vld [vmem:[%s9705_s22 + $0x458] sm:$0xff]  ;;  %v10976_v52 = vld [vmem:[%s9705_s22 + $0x469] sm:$0xff] }
 0x197   : > { %11417 = vst [vmem:[#allocation7_spill] sm:$0xff] %v10972_v4  ;;  %11418 = vst [vmem:[#allocation8_spill] sm:$0xff] %v10976_v52 }
 0x199   : > { %8586 = vmatmul.mubr.msk.f32.gmra.mrb[24].mxu1 %vm216_vm1, %v7043_v9  ;;  %9010 = vmatmul.mubr.msk.f32.gmra.mrb[24].mxu0 %vm216_vm1, %v10958_v27  ;;  %v7047_v9 = vld [vmem:[%s9705_s22 + $0x460] sm:$0xff] }
 0x19a   : > { %8588 = vmatprep.mubr.msk.f32.mxu1 %vm216_vm1, %v7044_v51  ;;  %9012 = vmatprep.mubr.msk.f32.mxu0 %vm216_vm1, %v10962_v59  ;;  %v10986_v51 = vld [vmem:[%s9705_s22 + $0x471] sm:$0xff]  ;;  %v7048_v59 = vld [vmem:[%s9705_s22 + $0x468] sm:$0xff]  ;;  %v10990_v27 = vld [vmem:[%s9705_s22 + $0x479] sm:$0xff] }
 0x19b   : > { %11419 = vst [vmem:[#allocation9_spill] sm:$0xff] %v10986_v51  ;;  %11420 = vst [vmem:[#allocation10_spill] sm:$0xff] %v10990_v27 }
 0x19d   : > { %8589 = vmatmul.mubr.msk.f32.gmra.mrb[26].mxu1 %vm216_vm1, %v7045_v18  ;;  %9013 = vmatmul.mubr.msk.f32.gmra.mrb[26].mxu0 %vm216_vm1, %v10972_v4  ;;  %v11000_v18 = vld [vmem:[%s9705_s22 + $0x481] sm:$0xff]  ;;  %v7542_v4 = vld [vmem:[%s9705_s22 + $0x489] sm:$0xff] }
 0x19e   : > { %8591 = vmatprep.mubr.msk.f32.mxu1 %vm216_vm1, %v7046_v54  ;;  %9015 = vmatprep.mubr.msk.f32.mxu0 %vm216_vm1, %v10976_v52  ;;  %v7049_v54 = vld [vmem:[%s9705_s22 + $0x470] sm:$0xff]  ;;  %11421 = vst [vmem:[#allocation11_spill] sm:$0xff] %v11000_v18  ;;  %v7050_v52 = vld [vmem:[%s9705_s22 + $0x478] sm:$0xff] }
 0x1a1   : > { %8592 = vmatmul.mubr.msk.f32.gmra.mrb[28].mxu1 %vm216_vm1, %v7047_v9  ;;  %9016 = vmatmul.mubr.msk.f32.gmra.mrb[28].mxu0 %vm216_vm1, %v10986_v51  ;;  %v7543_v9 = vld [vmem:[%s9705_s22 + $0x491] sm:$0xff]  ;;  %v7580_v51 = vld [vmem:[%s9705_s22 + $0x262] sm:$0xff] }
 0x1a2   : > { %8594 = vmatprep.mubr.msk.f32.mxu1 %vm216_vm1, %v7048_v59  ;;  %9018 = vmatprep.mubr.msk.f32.mxu0 %vm216_vm1, %v10990_v27  ;;  %v7051_v59 = vld [vmem:[%s9705_s22 + $0x480] sm:$0xff]  ;;  %v7088_v27 = vld [vmem:[%s9705_s22 + $0x251] sm:$0xff] }
 0x1a5   : > { %8595 = vmatmul.mubr.msk.f32.gmra.mrb[30].mxu1 %vm216_vm1, %v7049_v54  ;;  %9019 = vmatmul.mubr.msk.f32.gmra.mrb[30].mxu0 %vm216_vm1, %v11000_v18  ;;  %v7089_v54 = vld [vmem:[%s9705_s22 + $0x259] sm:$0xff] }
 0x1a6   : > { %8597 = vmatprep.mubr.msk.f32.mxu1 %vm216_vm1, %v7050_v52  ;;  %9021 = vmatprep.mubr.msk.f32.mxu0 %vm216_vm1, %v7542_v4  ;;  %v7581_v52 = vld [vmem:[%s9705_s22 + $0x26a] sm:$0xff]  ;;  %v7582_v18 = vld [vmem:[%s9705_s22 + $0x272] sm:$0xff]  ;;  %v7584_v4 = vld [vmem:[%s9705_s22 + $0x282] sm:$0xff] }
 0x1a9   : > { %8598 = vmatmul.mubr.msk.f32.gmra.mrb[32].mxu1 %vm216_vm1, %v7051_v59  ;;  %9022 = vmatmul.mubr.msk.f32.gmra.mrb[32].mxu0 %vm216_vm1, %v7543_v9  ;;  %v7655_v59 = vld [vmem:[%s9705_s22 + $0x3b2] sm:$0xff]  ;;  %v7656_v9 = vld [vmem:[%s9705_s22 + $0x3ba] sm:$0xff] }
 0x1aa   : > { %8602 = vmatprep.mubr.msk.f32.mxu1 %vm216_vm1, %v7088_v27  ;;  %9026 = vmatprep.mubr.msk.f32.mxu0 %vm216_vm1, %v7580_v51  ;;  %v7583_v27 = vld [vmem:[%s9705_s22 + $0x27a] sm:$0xff] }
 0x1ab   : > { %v7652_v51 = vld [vmem:[%s9705_s22 + $0x39a] sm:$0xff] }
 0x1ad   : > { %8603 = vmatmul.mubr.msk.f32.vlgmr.msra.gmra.mrb[0].mxu1 %vm216_vm1, %v7089_v54  ;;  %9027 = vmatmul.mubr.msk.f32.vlgmr.msra.gmra.mrb[0].mxu0 %vm216_vm1, %v7581_v52  ;;  %v7676_v54 = vld [vmem:[%s9705_s22 + $0x45a] sm:$0xff]  ;;  %v11423_v52 = vld [vmem:[#allocation3_spill] sm:$0xff] }
 0x1ae   : > { %8654 = vmatpush3.msk.msra.mxu1 %vm319_vm0, %v10784_v24  ;;  %9078 = vmatpush3.msk.msra.mxu0 %vm319_vm0, %v10789_v28  ;;  %v7585_v24 = vld [vmem:[%s9705_s22 + $0x28a] sm:$0xff]  ;;  %v7586_v28 = vld [vmem:[%s9705_s22 + $0x292] sm:$0xff] }
 0x1af   : > { %8605 = vmatprep.mubr.msk.f32.mxu1 %vm216_vm1, %v10512_v31  ;;  %9029 = vmatprep.mubr.msk.f32.mxu0 %vm216_vm1, %v7582_v18  ;;  %v7587_v31 = vld [vmem:[%s9705_s22 + $0x29a] sm:$0xff]  ;;  %v7654_v18 = vld [vmem:[%s9705_s22 + $0x3aa] sm:$0xff] }
 0x1b1   : > { %8606 = vmatmul.mubr.msk.f32.gmra.mrb[2].mxu1 %vm216_vm1, %v10522_v37  ;;  %9030 = vmatmul.mubr.msk.f32.gmra.mrb[2].mxu0 %vm216_vm1, %v7583_v27  ;;  %v7588_v37 = vld [vmem:[%s9705_s22 + $0x2a2] sm:$0xff]  ;;  %v7678_v27 = vld [vmem:[%s9705_s22 + $0x46a] sm:$0xff] }
 0x1b2   : > { %8608 = vmatprep.mubr.msk.f32.mxu1 %vm216_vm1, %v10526_v41  ;;  %9032 = vmatprep.mubr.msk.f32.mxu0 %vm216_vm1, %v7584_v4  ;;  %v7589_v41 = vld [vmem:[%s9705_s22 + $0x2aa] sm:$0xff]  ;;  %v11425_v4 = vld [vmem:[#allocation5_spill] sm:$0xff] }
 0x1b5   : > { %8609 = vmatmul.mubr.msk.f32.gmra.mrb[4].mxu1 %vm216_vm1, %v10547_v49  ;;  %9033 = vmatmul.mubr.msk.f32.gmra.mrb[4].mxu0 %vm216_vm1, %v7585_v24  ;;  %v7590_v49 = vld [vmem:[%s9705_s22 + $0x2b2] sm:$0xff]  ;;  %v11426_v24 = vld [vmem:[#allocation6_spill] sm:$0xff] }
 0x1b6   : > { %8611 = vmatprep.mubr.msk.f32.mxu1 %vm216_vm1, %v10554_v53  ;;  %9035 = vmatprep.mubr.msk.f32.mxu0 %vm216_vm1, %v7586_v28  ;;  %v7591_v53 = vld [vmem:[%s9705_s22 + $0x2ba] sm:$0xff]  ;;  %v7679_v28 = vld [vmem:[%s9705_s22 + $0x472] sm:$0xff] }
 0x1b9   : > { %8612 = vmatmul.mubr.msk.f32.gmra.mrb[6].mxu1 %vm216_vm1, %v10568_v57  ;;  %9036 = vmatmul.mubr.msk.f32.gmra.mrb[6].mxu0 %vm216_vm1, %v7587_v31  ;;  %v7592_v57 = vld [vmem:[%s9705_s22 + $0x2c2] sm:$0xff]  ;;  %v7680_v31 = vld [vmem:[%s9705_s22 + $0x47a] sm:$0xff] }
 0x1ba   : > { %8614 = vmatprep.mubr.msk.f32.mxu1 %vm216_vm1, %v10572_v61  ;;  %9038 = vmatprep.mubr.msk.f32.mxu0 %vm216_vm1, %v7588_v37  ;;  %v7593_v61 = vld [vmem:[%s9705_s22 + $0x2ca] sm:$0xff] }
 0x1bb   : > { %v11427_v37 = vld [vmem:[#allocation7_spill] sm:$0xff] }
 0x1bd   : > { %8615 = vmatmul.mubr.msk.f32.gmra.mrb[8].mxu1 %vm216_vm1, %v10582_v1  ;;  %9039 = vmatmul.mubr.msk.f32.gmra.mrb[8].mxu0 %vm216_vm1, %v7589_v41  ;;  %v7594_v1 = vld [vmem:[%s9705_s22 + $0x2d2] sm:$0xff] }
 0x1be   : > { %8617 = vmatprep.mubr.msk.f32.mxu1 %vm216_vm1, %v10586_v26  ;;  %9041 = vmatprep.mubr.msk.f32.mxu0 %vm216_vm1, %v7590_v49  ;;  %v7595_v26 = vld [vmem:[%s9705_s22 + $0x2da] sm:$0xff]  ;;  %v11428_v41 = vld [vmem:[#allocation8_spill] sm:$0xff]  ;;  %v7681_v49 = vld [vmem:[%s9705_s22 + $0x482] sm:$0xff] }
 0x1c1   : > { %8618 = vmatmul.mubr.msk.f32.gmra.mrb[10].mxu1 %vm216_vm1, %v10596_v6  ;;  %9042 = vmatmul.mubr.msk.f32.gmra.mrb[10].mxu0 %vm216_vm1, %v7591_v53  ;;  %v7596_v6 = vld [vmem:[%s9705_s22 + $0x2e2] sm:$0xff]  ;;  %v7682_v53 = vld [vmem:[%s9705_s22 + $0x48a] sm:$0xff] }
 0x1c2   : > { %8620 = vmatprep.mubr.msk.f32.mxu1 %vm216_vm1, %v10600_v58  ;;  %9044 = vmatprep.mubr.msk.f32.mxu0 %vm216_vm1, %v7592_v57  ;;  %v7597_v58 = vld [vmem:[%s9705_s22 + $0x2ea] sm:$0xff]  ;;  %v11429_v57 = vld [vmem:[#allocation9_spill] sm:$0xff] }
 0x1c5   : > { %8621 = vmatmul.mubr.msk.f32.gmra.mrb[12].mxu1 %vm216_vm1, %v10610_v50  ;;  %9045 = vmatmul.mubr.msk.f32.gmra.mrb[12].mxu0 %vm216_vm1, %v7593_v61  ;;  %v7598_v50 = vld [vmem:[%s9705_s22 + $0x2f2] sm:$0xff]  ;;  %v11430_v61 = vld [vmem:[#allocation10_spill] sm:$0xff] }
 0x1c6   : > { %8623 = vmatprep.mubr.msk.f32.mxu1 %vm216_vm1, %v10614_v38  ;;  %9047 = vmatprep.mubr.msk.f32.mxu0 %vm216_vm1, %v7594_v1  ;;  %v7599_v38 = vld [vmem:[%s9705_s22 + $0x2fa] sm:$0xff]  ;;  %v7683_v1 = vld [vmem:[%s9705_s22 + $0x492] sm:$0xff] }
 0x1c9   : > { %8624 = vmatmul.mubr.msk.f32.gmra.mrb[14].mxu1 %vm216_vm1, %v10624_v36  ;;  %9048 = vmatmul.mubr.msk.f32.gmra.mrb[14].mxu0 %vm216_vm1, %v7595_v26  ;;  %v7600_v36 = vld [vmem:[%s9705_s22 + $0x302] sm:$0xff] }
 0x1ca   : > { %8626 = vmatprep.mubr.msk.f32.mxu1 %vm216_vm1, %v10628_v11  ;;  %9050 = vmatprep.mubr.msk.f32.mxu0 %vm216_vm1, %v7596_v6  ;;  %v7601_v11 = vld [vmem:[%s9705_s22 + $0x30a] sm:$0xff] }
 0x1cb   : > { %v11431_v26 = vld [vmem:[#allocation11_spill] sm:$0xff] }
 0x1cd   : > { %8627 = vmatmul.mubr.msk.f32.gmra.mrb[16].mxu1 %vm216_vm1, %v10638_v48  ;;  %9051 = vmatmul.mubr.msk.f32.gmra.mrb[16].mxu0 %vm216_vm1, %v7597_v58  ;;  %v7602_v48 = vld [vmem:[%s9705_s22 + $0x312] sm:$0xff] }
 0x1ce   : > { %8629 = vmatprep.mubr.msk.f32.mxu1 %vm216_vm1, %v10642_v56  ;;  %9053 = vmatprep.mubr.msk.f32.mxu0 %vm216_vm1, %v7598_v50  ;;  %v7603_v56 = vld [vmem:[%s9705_s22 + $0x31a] sm:$0xff] }
 0x1d1   : > { %8630 = vmatmul.mubr.msk.f32.gmra.mrb[18].mxu1 %vm216_vm1, %v10652_v0  ;;  %9054 = vmatmul.mubr.msk.f32.gmra.mrb[18].mxu0 %vm216_vm1, %v7599_v38  ;;  %v7604_v0 = vld [vmem:[%s9705_s22 + $0x322] sm:$0xff] }
 0x1d2   : > { %8632 = vmatprep.mubr.msk.f32.mxu1 %vm216_vm1, %v10656_v12  ;;  %9056 = vmatprep.mubr.msk.f32.mxu0 %vm216_vm1, %v7600_v36  ;;  %v7605_v12 = vld [vmem:[%s9705_s22 + $0x32a] sm:$0xff] }
 0x1d5   : > { %8633 = vmatmul.mubr.msk.f32.gmra.mrb[20].mxu1 %vm216_vm1, %v10666_v22  ;;  %9057 = vmatmul.mubr.msk.f32.gmra.mrb[20].mxu0 %vm216_vm1, %v7601_v11  ;;  %v7606_v22 = vld [vmem:[%s9705_s22 + $0x332] sm:$0xff] }
 0x1d6   : > { %8635 = vmatprep.mubr.msk.f32.mxu1 %vm216_vm1, %v10670_v10  ;;  %9059 = vmatprep.mubr.msk.f32.mxu0 %vm216_vm1, %v7602_v48  ;;  %v7607_v10 = vld [vmem:[%s9705_s22 + $0x33a] sm:$0xff] }
 0x1d9   : > { %8636 = vmatmul.mubr.msk.f32.gmra.mrb[22].mxu1 %vm216_vm1, %v10680_v46  ;;  %9060 = vmatmul.mubr.msk.f32.gmra.mrb[22].mxu0 %vm216_vm1, %v7603_v56  ;;  %v7608_v46 = vld [vmem:[%s9705_s22 + $0x342] sm:$0xff] }
 0x1da   : > { %8638 = vmatprep.mubr.msk.f32.mxu1 %vm216_vm1, %v10684_v42  ;;  %9062 = vmatprep.mubr.msk.f32.mxu0 %vm216_vm1, %v7604_v0  ;;  %v7609_v42 = vld [vmem:[%s9705_s22 + $0x34a] sm:$0xff] }
 0x1dd   : > { %8639 = vmatmul.mubr.msk.f32.gmra.mrb[24].mxu1 %vm216_vm1, %v10694_v62  ;;  %9063 = vmatmul.mubr.msk.f32.gmra.mrb[24].mxu0 %vm216_vm1, %v7605_v12  ;;  %v7610_v62 = vld [vmem:[%s9705_s22 + $0x352] sm:$0xff] }
 0x1de   : > { %8641 = vmatprep.mubr.msk.f32.mxu1 %vm216_vm1, %v10698_v30  ;;  %9065 = vmatprep.mubr.msk.f32.mxu0 %vm216_vm1, %v7606_v22  ;;  %v7611_v30 = vld [vmem:[%s9705_s22 + $0x35a] sm:$0xff] }
 0x1e1   : > { %8642 = vmatmul.mubr.msk.f32.gmra.mrb[26].mxu1 %vm216_vm1, %v10708_v32  ;;  %9066 = vmatmul.mubr.msk.f32.gmra.mrb[26].mxu0 %vm216_vm1, %v7607_v10  ;;  %v7612_v32 = vld [vmem:[%s9705_s22 + $0x362] sm:$0xff] }
 0x1e2   : > { %8644 = vmatprep.mubr.msk.f32.mxu1 %vm216_vm1, %v10712_v13  ;;  %9068 = vmatprep.mubr.msk.f32.mxu0 %vm216_vm1, %v7608_v46  ;;  %v7613_v13 = vld [vmem:[%s9705_s22 + $0x36a] sm:$0xff] }
 0x1e5   : > { %8645 = vmatmul.mubr.msk.f32.gmra.mrb[28].mxu1 %vm216_vm1, %v10722_v17  ;;  %9069 = vmatmul.mubr.msk.f32.gmra.mrb[28].mxu0 %vm216_vm1, %v7609_v42  ;;  %v7158_v17 = vld [vmem:[%s9705_s22 + $0x379] sm:$0xff] }
 0x1e6   : > { %8647 = vmatprep.mubr.msk.f32.mxu1 %vm216_vm1, %v10726_v21  ;;  %9071 = vmatprep.mubr.msk.f32.mxu0 %vm216_vm1, %v7610_v62  ;;  %v7650_v21 = vld [vmem:[%s9705_s22 + $0x38a] sm:$0xff] }
 0x1e9   : > { %8648 = vmatmul.mubr.msk.f32.gmra.mrb[30].mxu1 %vm216_vm1, %v10736_v25  ;;  %9072 = vmatmul.mubr.msk.f32.gmra.mrb[30].mxu0 %vm216_vm1, %v7611_v30  ;;  %v7159_v25 = vld [vmem:[%s9705_s22 + $0x381] sm:$0xff] }
 0x1ea   : > { %8650 = vmatprep.mubr.msk.f32.mxu1 %vm216_vm1, %v10740_v29  ;;  %9074 = vmatprep.mubr.msk.f32.mxu0 %vm216_vm1, %v7612_v32  ;;  %v7651_v29 = vld [vmem:[%s9705_s22 + $0x392] sm:$0xff] }
 0x1ed   : > { %8651 = vmatmul.mubr.msk.f32.gmra.mrb[32].mxu1 %vm216_vm1, %v10750_v35  ;;  %9075 = vmatmul.mubr.msk.f32.gmra.mrb[32].mxu0 %vm216_vm1, %v7613_v13  ;;  %v7653_v35 = vld [vmem:[%s9705_s22 + $0x3a2] sm:$0xff] }
 0x1ee   : > { %8655 = vmatprep.mubr.msk.f32.mxu1 %vm216_vm1, %v7158_v17  ;;  %9079 = vmatprep.mubr.msk.f32.mxu0 %vm216_vm1, %v7650_v21 }
 0x1f1   : > { %8656 = vmatmul.mubr.msk.f32.vlgmr.msra.gmra.mrb[0].mxu1 %vm216_vm1, %v7159_v25  ;;  %9080 = vmatmul.mubr.msk.f32.vlgmr.msra.gmra.mrb[0].mxu0 %vm216_vm1, %v7651_v29 }
 0x1f2   : > { %8658 = vmatprep.mubr.msk.f32.mxu1 %vm216_vm1, %v10763_v63  ;;  %9082 = vmatprep.mubr.msk.f32.mxu0 %vm216_vm1, %v7652_v51  ;;  %v7657_v63 = vld [vmem:[%s9705_s22 + $0x3c2] sm:$0xff] }
 0x1f5   : > { %8659 = vmatmul.mubr.msk.f32.gmra.mrb[2].mxu1 %vm216_vm1, %v10772_v3  ;;  %9083 = vmatmul.mubr.msk.f32.gmra.mrb[2].mxu0 %vm216_vm1, %v7653_v35  ;;  %v7658_v3 = vld [vmem:[%s9705_s22 + $0x3ca] sm:$0xff] }
 0x1f6   : > { %8661 = vmatprep.mubr.msk.f32.mxu1 %vm216_vm1, %v10776_v20  ;;  %9085 = vmatprep.mubr.msk.f32.mxu0 %vm216_vm1, %v7654_v18  ;;  %v7659_v20 = vld [vmem:[%s9705_s22 + $0x3d2] sm:$0xff] }
 0x1f9   : > { %8662 = vmatmul.mubr.msk.f32.gmra.mrb[4].mxu1 %vm216_vm1, %v10797_v44  ;;  %9086 = vmatmul.mubr.msk.f32.gmra.mrb[4].mxu0 %vm216_vm1, %v7655_v59  ;;  %v7660_v44 = vld [vmem:[%s9705_s22 + $0x3da] sm:$0xff] }
 0x1fa   : > { %8664 = vmatprep.mubr.msk.f32.mxu1 %vm216_vm1, %v10804_v60  ;;  %9088 = vmatprep.mubr.msk.f32.mxu0 %vm216_vm1, %v7656_v9  ;;  %v7661_v60 = vld [vmem:[%s9705_s22 + $0x3e2] sm:$0xff] }
 0x1fd   : > { %8665 = vmatmul.mubr.msk.f32.gmra.mrb[6].mxu1 %vm216_vm1, %v10818_v45  ;;  %9089 = vmatmul.mubr.msk.f32.gmra.mrb[6].mxu0 %vm216_vm1, %v7657_v63  ;;  %v7662_v45 = vld [vmem:[%s9705_s22 + $0x3ea] sm:$0xff] }
 0x1fe   : > { %8667 = vmatprep.mubr.msk.f32.mxu1 %vm216_vm1, %v10822_v16  ;;  %9091 = vmatprep.mubr.msk.f32.mxu0 %vm216_vm1, %v7658_v3  ;;  %v7663_v16 = vld [vmem:[%s9705_s22 + $0x3f2] sm:$0xff] }
 0x201   : > { %8668 = vmatmul.mubr.msk.f32.gmra.mrb[8].mxu1 %vm216_vm1, %v10832_v2  ;;  %9092 = vmatmul.mubr.msk.f32.gmra.mrb[8].mxu0 %vm216_vm1, %v7659_v20  ;;  %v7664_v2 = vld [vmem:[%s9705_s22 + $0x3fa] sm:$0xff] }
 0x202   : > { %8670 = vmatprep.mubr.msk.f32.mxu1 %vm216_vm1, %v10836_v14  ;;  %9094 = vmatprep.mubr.msk.f32.mxu0 %vm216_vm1, %v7660_v44  ;;  %v7665_v14 = vld [vmem:[%s9705_s22 + $0x402] sm:$0xff] }
 0x205   : > { %8671 = vmatmul.mubr.msk.f32.gmra.mrb[10].mxu1 %vm216_vm1, %v10846_v7  ;;  %9095 = vmatmul.mubr.msk.f32.gmra.mrb[10].mxu0 %vm216_vm1, %v7661_v60  ;;  %v7666_v7 = vld [vmem:[%s9705_s22 + $0x40a] sm:$0xff] }
 0x206   : > { %8673 = vmatprep.mubr.msk.f32.mxu1 %vm216_vm1, %v10850_v15  ;;  %9097 = vmatprep.mubr.msk.f32.mxu0 %vm216_vm1, %v7662_v45  ;;  %v7667_v15 = vld [vmem:[%s9705_s22 + $0x412] sm:$0xff] }
 0x209   : > { %8674 = vmatmul.mubr.msk.f32.gmra.mrb[12].mxu1 %vm216_vm1, %v10860_v23  ;;  %9098 = vmatmul.mubr.msk.f32.gmra.mrb[12].mxu0 %vm216_vm1, %v7663_v16  ;;  %v7668_v23 = vld [vmem:[%s9705_s22 + $0x41a] sm:$0xff] }
 0x20a   : > { %8676 = vmatprep.mubr.msk.f32.mxu1 %vm216_vm1, %v10864_v33  ;;  %9100 = vmatprep.mubr.msk.f32.mxu0 %vm216_vm1, %v7664_v2  ;;  %v7669_v33 = vld [vmem:[%s9705_s22 + $0x422] sm:$0xff] }
 0x20d   : > { %8677 = vmatmul.mubr.msk.f32.gmra.mrb[14].mxu1 %vm216_vm1, %v10874_v47  ;;  %9101 = vmatmul.mubr.msk.f32.gmra.mrb[14].mxu0 %vm216_vm1, %v7665_v14  ;;  %v7670_v47 = vld [vmem:[%s9705_s22 + $0x42a] sm:$0xff] }
 0x20e   : > { %8679 = vmatprep.mubr.msk.f32.mxu1 %vm216_vm1, %v10878_v55  ;;  %9103 = vmatprep.mubr.msk.f32.mxu0 %vm216_vm1, %v7666_v7  ;;  %v7671_v55 = vld [vmem:[%s9705_s22 + $0x432] sm:$0xff] }
 0x211   : > { %8680 = vmatmul.mubr.msk.f32.gmra.mrb[16].mxu1 %vm216_vm1, %v10888_v8  ;;  %9104 = vmatmul.mubr.msk.f32.gmra.mrb[16].mxu0 %vm216_vm1, %v7667_v15  ;;  %v7672_v8 = vld [vmem:[%s9705_s22 + $0x43a] sm:$0xff] }
 0x212   : > { %8682 = vmatprep.mubr.msk.f32.mxu1 %vm216_vm1, %v10892_v40  ;;  %9106 = vmatprep.mubr.msk.f32.mxu0 %vm216_vm1, %v7668_v23  ;;  %v7673_v40 = vld [vmem:[%s9705_s22 + $0x442] sm:$0xff] }
 0x215   : > { %8683 = vmatmul.mubr.msk.f32.gmra.mrb[18].mxu1 %vm216_vm1, %v10902_v43  ;;  %9107 = vmatmul.mubr.msk.f32.gmra.mrb[18].mxu0 %vm216_vm1, %v7669_v33  ;;  %v7674_v43 = vld [vmem:[%s9705_s22 + $0x44a] sm:$0xff] }
 0x216   : > { %8685 = vmatprep.mubr.msk.f32.mxu1 %vm216_vm1, %v10906_v34  ;;  %9109 = vmatprep.mubr.msk.f32.mxu0 %vm216_vm1, %v7670_v47  ;;  %v11422_v34 = vld [vmem:[#allocation2_spill] sm:$0xff] }
 0x219   : > { %8686 = vmatmul.mubr.msk.f32.gmra.mrb[20].mxu1 %vm216_vm1, %v10916_v5  ;;  %9110 = vmatmul.mubr.msk.f32.gmra.mrb[20].mxu0 %vm216_vm1, %v7671_v55  ;;  %v7675_v5 = vld [vmem:[%s9705_s22 + $0x452] sm:$0xff] }
 0x21a   : > { %8688 = vmatprep.mubr.msk.f32.mxu1 %vm216_vm1, %v10920_v19  ;;  %9112 = vmatprep.mubr.msk.f32.mxu0 %vm216_vm1, %v7672_v8  ;;  %v11424_v19 = vld [vmem:[#allocation4_spill] sm:$0xff] }
 0x21d   : > { %8689 = vmatmul.mubr.msk.f32.gmra.mrb[22].mxu1 %vm216_vm1, %v10930_v39  ;;  %9113 = vmatmul.mubr.msk.f32.gmra.mrb[22].mxu0 %vm216_vm1, %v7673_v40  ;;  %v7677_v39 = vld [vmem:[%s9705_s22 + $0x462] sm:$0xff] }
 0x21e   : > { %8691 = vmatprep.mubr.msk.f32.mxu1 %vm216_vm1, %v11422_v34  ;;  %9115 = vmatprep.mubr.msk.f32.mxu0 %vm216_vm1, %v7674_v43 }
 0x221   : > { %8692 = vmatmul.mubr.msk.f32.gmra.mrb[24].mxu1 %vm216_vm1, %v11423_v52  ;;  %9116 = vmatmul.mubr.msk.f32.gmra.mrb[24].mxu0 %vm216_vm1, %v7675_v5 }
 0x222   : > { %8694 = vmatprep.mubr.msk.f32.mxu1 %vm216_vm1, %v11424_v19  ;;  %9118 = vmatprep.mubr.msk.f32.mxu0 %vm216_vm1, %v7676_v54 }
 0x225   : > { %8695 = vmatmul.mubr.msk.f32.gmra.mrb[26].mxu1 %vm216_vm1, %v11425_v4  ;;  %9119 = vmatmul.mubr.msk.f32.gmra.mrb[26].mxu0 %vm216_vm1, %v7677_v39 }
 0x226   : > { %8697 = vmatprep.mubr.msk.f32.mxu1 %vm216_vm1, %v11426_v24  ;;  %9121 = vmatprep.mubr.msk.f32.mxu0 %vm216_vm1, %v7678_v27 }
 0x229   : > { %8698 = vmatmul.mubr.msk.f32.gmra.mrb[28].mxu1 %vm216_vm1, %v11427_v37  ;;  %9122 = vmatmul.mubr.msk.f32.gmra.mrb[28].mxu0 %vm216_vm1, %v7679_v28 }
 0x22a   : > { %8700 = vmatprep.mubr.msk.f32.mxu1 %vm216_vm1, %v11428_v41  ;;  %9124 = vmatprep.mubr.msk.f32.mxu0 %vm216_vm1, %v7680_v31 }
 0x22d   : > { %8701 = vmatmul.mubr.msk.f32.gmra.mrb[30].mxu1 %vm216_vm1, %v11429_v57  ;;  %9125 = vmatmul.mubr.msk.f32.gmra.mrb[30].mxu0 %vm216_vm1, %v7681_v49 }
 0x22e   : > { %8703 = vmatprep.mubr.msk.f32.mxu1 %vm216_vm1, %v11430_v61  ;;  %9127 = vmatprep.mubr.msk.f32.mxu0 %vm216_vm1, %v7682_v53 }
 0x231   : > { %8704 = vmatmul.mubr.msk.f32.gmra.mrb[32].mxu1 %vm216_vm1, %v11431_v26  ;;  %9128 = vmatmul.mubr.msk.f32.gmra.mrb[32].mxu0 %vm216_vm1, %v7683_v1 }
 0x2c4   : > { %v8657_v6 = vpop.f32.mrb[0].mxu1  ;;  %v9081_v58 = vpop.f32.mrb[0].mxu0 }
 0x2c5   : > { %v9130_v50 = vadd.f32 %v9081_v58, %v8657_v6  ;;  %v3157_v38 = vpop.f32.mrb[1].mxu1  ;;  %v6437_v36 = vpop.f32.mrb[1].mxu0 }
 0x2c6   : > { %v9131_v11 = vadd.f32 %v6437_v36, %v3157_v38 }
 0x2c7   : > { %6642 = vst.msk [vmem:[%s11293_s25 + $0x8] sm:$0xff] %vm6640_vm2, %v9130_v50 }
 0x2c8   : > { %6641 = vst.msk [vmem:[%s11293_s25] sm:$0xff] %vm6640_vm2, %v9131_v11  ;;  %v8660_v48 = vpop.f32.mrb[2].mxu1  ;;  %v9084_v56 = vpop.f32.mrb[2].mxu0 }
 0x2c9   : > { %v9132_v0 = vadd.f32 %v9084_v56, %v8660_v48  ;;  %v3167_v12 = vpop.f32.mrb[3].mxu1  ;;  %v6447_v22 = vpop.f32.mrb[3].mxu0 }
 0x2ca   : > { %v9133_v10 = vadd.f32 %v6447_v22, %v3167_v12 }
 0x2cb   : > { %6644 = vst.msk [vmem:[%s11293_s25 + $0x18] sm:$0xff] %vm6640_vm2, %v9132_v0 }
 0x2cc   : > { %6643 = vst.msk [vmem:[%s11293_s25 + $0x10] sm:$0xff] %vm6640_vm2, %v9133_v10  ;;  %v8663_v46 = vpop.f32.mrb[4].mxu1  ;;  %v9087_v42 = vpop.f32.mrb[4].mxu0 }
 0x2cd   : > { %v9134_v62 = vadd.f32 %v9087_v42, %v8663_v46  ;;  %v3177_v30 = vpop.f32.mrb[5].mxu1  ;;  %v6457_v32 = vpop.f32.mrb[5].mxu0 }
 0x2ce   : > { %v9135_v13 = vadd.f32 %v6457_v32, %v3177_v30 }
 0x2cf   : > { %6646 = vst.msk [vmem:[%s11293_s25 + $0x28] sm:$0xff] %vm6640_vm2, %v9134_v62 }
 0x2d0   : > { %6645 = vst.msk [vmem:[%s11293_s25 + $0x20] sm:$0xff] %vm6640_vm2, %v9135_v13  ;;  %v8666_v17 = vpop.f32.mrb[6].mxu1  ;;  %v9090_v21 = vpop.f32.mrb[6].mxu0 }
 0x2d1   : > { %v9136_v25 = vadd.f32 %v9090_v21, %v8666_v17  ;;  %v3187_v29 = vpop.f32.mrb[7].mxu1  ;;  %v6467_v51 = vpop.f32.mrb[7].mxu0 }
 0x2d2   : > { %v9137_v35 = vadd.f32 %v6467_v51, %v3187_v29 }
 0x2d3   : > { %6648 = vst.msk [vmem:[%s11293_s25 + $0x38] sm:$0xff] %vm6640_vm2, %v9136_v25 }
 0x2d4   : > { %6647 = vst.msk [vmem:[%s11293_s25 + $0x30] sm:$0xff] %vm6640_vm2, %v9137_v35  ;;  %v8669_v18 = vpop.f32.mrb[8].mxu1  ;;  %v9093_v59 = vpop.f32.mrb[8].mxu0 }
 0x2d5   : > { %v9138_v9 = vadd.f32 %v9093_v59, %v8669_v18  ;;  %v3197_v63 = vpop.f32.mrb[9].mxu1  ;;  %v6477_v3 = vpop.f32.mrb[9].mxu0 }
 0x2d6   : > { %v9139_v20 = vadd.f32 %v6477_v3, %v3197_v63 }
 0x2d7   : > { %6650 = vst.msk [vmem:[%s11293_s25 + $0x48] sm:$0xff] %vm6640_vm2, %v9138_v9 }
 0x2d8   : > { %6649 = vst.msk [vmem:[%s11293_s25 + $0x40] sm:$0xff] %vm6640_vm2, %v9139_v20  ;;  %v8672_v44 = vpop.f32.mrb[10].mxu1  ;;  %v9096_v60 = vpop.f32.mrb[10].mxu0 }
 0x2d9   : > { %v9140_v45 = vadd.f32 %v9096_v60, %v8672_v44  ;;  %v3207_v16 = vpop.f32.mrb[11].mxu1  ;;  %v6487_v2 = vpop.f32.mrb[11].mxu0 }
 0x2da   : > { %v9141_v14 = vadd.f32 %v6487_v2, %v3207_v16 }
 0x2db   : > { %6652 = vst.msk [vmem:[%s11293_s25 + $0x58] sm:$0xff] %vm6640_vm2, %v9140_v45 }
 0x2dc   : > { %6651 = vst.msk [vmem:[%s11293_s25 + $0x50] sm:$0xff] %vm6640_vm2, %v9141_v14  ;;  %v8675_v7 = vpop.f32.mrb[12].mxu1  ;;  %v9099_v15 = vpop.f32.mrb[12].mxu0 }
 0x2dd   : > { %v9142_v23 = vadd.f32 %v9099_v15, %v8675_v7  ;;  %v3217_v33 = vpop.f32.mrb[13].mxu1  ;;  %v6497_v47 = vpop.f32.mrb[13].mxu0 }
 0x2de   : > { %v9143_v55 = vadd.f32 %v6497_v47, %v3217_v33 }
 0x2df   : > { %6654 = vst.msk [vmem:[%s11293_s25 + $0x68] sm:$0xff] %vm6640_vm2, %v9142_v23 }
 0x2e0   : > { %6653 = vst.msk [vmem:[%s11293_s25 + $0x60] sm:$0xff] %vm6640_vm2, %v9143_v55  ;;  %v8678_v8 = vpop.f32.mrb[14].mxu1  ;;  %v9102_v40 = vpop.f32.mrb[14].mxu0 }
 0x2e1   : > { %v9144_v43 = vadd.f32 %v9102_v40, %v8678_v8  ;;  %v3227_v34 = vpop.f32.mrb[15].mxu1  ;;  %v6507_v5 = vpop.f32.mrb[15].mxu0 }
 0x2e2   : > { %v9145_v54 = vadd.f32 %v6507_v5, %v3227_v34 }
 0x2e3   : > { %6656 = vst.msk [vmem:[%s11293_s25 + $0x78] sm:$0xff] %vm6640_vm2, %v9144_v43 }
 0x2e4   : > { %6655 = vst.msk [vmem:[%s11293_s25 + $0x70] sm:$0xff] %vm6640_vm2, %v9145_v54  ;;  %v8681_v52 = vpop.f32.mrb[16].mxu1  ;;  %v9105_v19 = vpop.f32.mrb[16].mxu0 }
 0x2e5   : > { %v9146_v39 = vadd.f32 %v9105_v19, %v8681_v52  ;;  %v3237_v27 = vpop.f32.mrb[17].mxu1  ;;  %v6517_v4 = vpop.f32.mrb[17].mxu0 }
 0x2e6   : > { %v9147_v24 = vadd.f32 %v6517_v4, %v3237_v27 }
 0x2e7   : > { %6658 = vst.msk [vmem:[%s11293_s25 + $0x88] sm:$0xff] %vm6640_vm2, %v9146_v39 }
 0x2e8   : > { %6657 = vst.msk [vmem:[%s11293_s25 + $0x80] sm:$0xff] %vm6640_vm2, %v9147_v24  ;;  %v8684_v28 = vpop.f32.mrb[18].mxu1  ;;  %v9108_v31 = vpop.f32.mrb[18].mxu0 }
 0x2e9   : > { %v9148_v37 = vadd.f32 %v9108_v31, %v8684_v28  ;;  %v3247_v41 = vpop.f32.mrb[19].mxu1  ;;  %v6527_v49 = vpop.f32.mrb[19].mxu0 }
 0x2ea   : > { %v9149_v53 = vadd.f32 %v6527_v49, %v3247_v41 }
 0x2eb   : > { %6660 = vst.msk [vmem:[%s11293_s25 + $0x98] sm:$0xff] %vm6640_vm2, %v9148_v37 }
 0x2ec   : > { %6659 = vst.msk [vmem:[%s11293_s25 + $0x90] sm:$0xff] %vm6640_vm2, %v9149_v53  ;;  %v8687_v57 = vpop.f32.mrb[20].mxu1  ;;  %v9111_v61 = vpop.f32.mrb[20].mxu0 }
 0x2ed   : > { %v9150_v1 = vadd.f32 %v9111_v61, %v8687_v57  ;;  %v3257_v26 = vpop.f32.mrb[21].mxu1  ;;  %v6537_v6 = vpop.f32.mrb[21].mxu0 }
 0x2ee   : > { %v9151_v58 = vadd.f32 %v6537_v6, %v3257_v26 }
 0x2ef   : > { %6662 = vst.msk [vmem:[%s11293_s25 + $0xa8] sm:$0xff] %vm6640_vm2, %v9150_v1 }
 0x2f0   : > { %6661 = vst.msk [vmem:[%s11293_s25 + $0xa0] sm:$0xff] %vm6640_vm2, %v9151_v58  ;;  %v8690_v50 = vpop.f32.mrb[22].mxu1  ;;  %v9114_v38 = vpop.f32.mrb[22].mxu0 }
 0x2f1   : > { %v9152_v36 = vadd.f32 %v9114_v38, %v8690_v50  ;;  %v3267_v11 = vpop.f32.mrb[23].mxu1  ;;  %v6547_v48 = vpop.f32.mrb[23].mxu0 }
 0x2f2   : > { %v9153_v56 = vadd.f32 %v6547_v48, %v3267_v11 }
 0x2f3   : > { %6664 = vst.msk [vmem:[%s11293_s25 + $0xb8] sm:$0xff] %vm6640_vm2, %v9152_v36 }
 0x2f4   : > { %6663 = vst.msk [vmem:[%s11293_s25 + $0xb0] sm:$0xff] %vm6640_vm2, %v9153_v56  ;;  %v8693_v0 = vpop.f32.mrb[24].mxu1  ;;  %v9117_v12 = vpop.f32.mrb[24].mxu0 }
 0x2f5   : > { %v9154_v22 = vadd.f32 %v9117_v12, %v8693_v0  ;;  %v3277_v10 = vpop.f32.mrb[25].mxu1  ;;  %v6557_v46 = vpop.f32.mrb[25].mxu0 }
 0x2f6   : > { %v9155_v42 = vadd.f32 %v6557_v46, %v3277_v10 }
 0x2f7   : > { %6666 = vst.msk [vmem:[%s11293_s25 + $0xc8] sm:$0xff] %vm6640_vm2, %v9154_v22 }
 0x2f8   : > { %6665 = vst.msk [vmem:[%s11293_s25 + $0xc0] sm:$0xff] %vm6640_vm2, %v9155_v42  ;;  %v8696_v62 = vpop.f32.mrb[26].mxu1  ;;  %v9120_v30 = vpop.f32.mrb[26].mxu0 }
 0x2f9   : > { %v9156_v32 = vadd.f32 %v9120_v30, %v8696_v62  ;;  %v3287_v13 = vpop.f32.mrb[27].mxu1  ;;  %v6567_v17 = vpop.f32.mrb[27].mxu0 }
 0x2fa   : > { %v9157_v21 = vadd.f32 %v6567_v17, %v3287_v13 }
 0x2fb   : > { %6668 = vst.msk [vmem:[%s11293_s25 + $0xd8] sm:$0xff] %vm6640_vm2, %v9156_v32 }
 0x2fc   : > { %6667 = vst.msk [vmem:[%s11293_s25 + $0xd0] sm:$0xff] %vm6640_vm2, %v9157_v21  ;;  %v8699_v25 = vpop.f32.mrb[28].mxu1  ;;  %v9123_v29 = vpop.f32.mrb[28].mxu0 }
 0x2fd   : > { %v9158_v51 = vadd.f32 %v9123_v29, %v8699_v25  ;;  %v3297_v35 = vpop.f32.mrb[29].mxu1  ;;  %v6577_v18 = vpop.f32.mrb[29].mxu0 }
 0x2fe   : > { %v9159_v59 = vadd.f32 %v6577_v18, %v3297_v35 }
 0x2ff   : > { %6670 = vst.msk [vmem:[%s11293_s25 + $0xe8] sm:$0xff] %vm6640_vm2, %v9158_v51 }
 0x300   : > { %6669 = vst.msk [vmem:[%s11293_s25 + $0xe0] sm:$0xff] %vm6640_vm2, %v9159_v59  ;;  %v8702_v9 = vpop.f32.mrb[30].mxu1  ;;  %v9126_v63 = vpop.f32.mrb[30].mxu0 }
 0x301   : > { %v9160_v3 = vadd.f32 %v9126_v63, %v8702_v9  ;;  %v3307_v20 = vpop.f32.mrb[31].mxu1  ;;  %v6587_v44 = vpop.f32.mrb[31].mxu0 }
 0x302   : > { %v9161_v60 = vadd.f32 %v6587_v44, %v3307_v20 }
 0x303   : > { %6672 = vst.msk [vmem:[%s11293_s25 + $0xf8] sm:$0xff] %vm6640_vm2, %v9160_v3 }
 0x304   : > { %6671 = vst.msk [vmem:[%s11293_s25 + $0xf0] sm:$0xff] %vm6640_vm2, %v9161_v60  ;;  %v8705_v45 = vpop.f32.mrb[32].mxu1  ;;  %v9129_v16 = vpop.f32.mrb[32].mxu0 }
 0x305   : > { %v9162_v2 = vadd.f32 %v9129_v16, %v8705_v45  ;;  %v3317_v14 = vpop.f32.mrb[33].mxu1  ;;  %v6597_v7 = vpop.f32.mrb[33].mxu0 }
 0x306   : > { %v9163_v15 = vadd.f32 %v6597_v7, %v3317_v14 }
 0x307   : > { %6674 = vst.msk [vmem:[%s11293_s25 + $0x108] sm:$0xff] %vm6640_vm2, %v9162_v2 }
 0x308   : > { %6673 = vst.msk [vmem:[%s11293_s25 + $0x100] sm:$0xff] %vm6640_vm2, %v9163_v15 }
 0x309 PF: > { %s12_s9 = sadd.s32 1, %s9656_s9  }
 0x30a   : > { %p9_p4 = scmp.ge.s32.totalorder %s12_s9, 4  }
 0x30c   :  { %11 = sbr.rel (!%p9_p4) target bundleno = 1 (0x1), region = 76 }

</bundles_post_ra>
